<compile_context>
chip_gen: v6e
topology: v6e:2x2x1
jax: 0.10.0
libtpu: 0.0.40
codegen_flags: <defaults>
</compile_context>

<pallas_src>
import functools

import jax
import jax.numpy as jnp
from jax.experimental import pallas as pl
from jax.experimental.pallas import tpu as pltpu


def _classifier_kernel(x_ref, w_ref, b_ref, o_ref):
    # x_ref: (TBp, P*D) VMEM tile (lane-dense), w_ref: (P*D, P) VMEM
    # (constant index_map -> fetched once per core), b_ref: (1, 1) SMEM,
    # o_ref: (TBp, P) VMEM (lane-dense stores).
    logits = jnp.dot(x_ref[...], w_ref[...], preferred_element_type=jnp.float32)
    o_ref[...] = jax.nn.sigmoid(logits + b_ref[0, 0]).astype(o_ref.dtype)


def classifier_forward(score_vec, weight, bias, *,
                       block_bytes=2 * 1024 * 1024, use_pallas=None):
    """sigmoid(score_vec @ weight + bias).reshape(-1)  (torch .view(-1)).

    score_vec: (B, in_dim) f32/bf16
    weight:    (in_dim, 1) (or (1, in_dim)) f32
    bias:      ()          f32
    returns:   (B,)        score_vec.dtype
    """
    B, D = score_vec.shape
    out_dtype = score_vec.dtype
    w_vec = jnp.asarray(weight).reshape(-1)            # (D,)
    bias_f32 = jnp.asarray(bias, jnp.float32)

    def _xla(x):                                       # small-batch / tail path
        y = jnp.dot(x, w_vec) + bias_f32
        return jax.nn.sigmoid(y).reshape(-1).astype(out_dtype)

    if use_pallas is None:
        # Kernel-launch overhead dominates tiny batches; let XLA fuse those.
        use_pallas = B >= 1024
    if not use_pallas:
        return _xla(score_vec)

    # ---- lane-dense packing: P original rows per packed row -----------------
    # P = 128 makes both the input (P*D lanes) and output (P lanes) lane-dense.
    P = 128 if D <= 64 else 1                          # big D: plain matvec path
    PD = P * D

    B_main = (B // P) * P
    n_pack = B_main // P
    if n_pack == 0:
        return _xla(score_vec)

    # Free row-major reshape when B is a multiple of P; otherwise the prefix
    # slice costs one copy of B_main rows (tail of < P rows goes through XLA
    # below -- no whole-array pad).
    x_main = score_vec if B_main == B else score_vec[:B_main]
    x_packed = x_main.reshape(n_pack, PD)

    # block-diagonal weight: w_bd[p*D + d, q] = w[d] * (p == q)
    if P > 1:
        w_bd = (jnp.eye(P, dtype=jnp.float32)[:, None, :]
                * w_vec.astype(jnp.float32)[None, :, None]).reshape(PD, P)
    else:
        w_bd = w_vec.reshape(D, 1).astype(jnp.float32)
    w_bd = w_bd.astype(x_packed.dtype)                 # bf16 stays native on MXU
    b_smem = bias_f32.reshape(1, 1)

    # ---- batch tiling over packed rows ---------------------------------------
    itemsize = x_packed.dtype.itemsize
    if n_pack <= 8:
        tbp = n_pack                                   # single full-extent block
    else:
        tbp = block_bytes // (PD * itemsize)           # ~block_bytes per tile
        tbp = min(tbp, pl.cdiv(n_pack, 4))             # keep >= ~4 grid steps
        tbp = max(8, (tbp // 8) * 8)                   # sublane multiple of 8
    grid = (pl.cdiv(n_pack, tbp),)                     # partial trailing block OK

    out = pl.pallas_call(
        _classifier_kernel,
        out_shape=jax.ShapeDtypeStruct((n_pack, P), out_dtype),
        grid=grid,
        in_specs=[
            pl.BlockSpec((tbp, PD), lambda i: (i, 0)),  # pipelined batch tiles
            pl.BlockSpec((PD, P), lambda i: (0, 0)),    # resident weight
            pl.BlockSpec(memory_space=pltpu.SMEM),      # (1,1) bias scalar
        ],
        out_specs=pl.BlockSpec((tbp, P), lambda i: (i, 0)),
        compiler_params=pltpu.CompilerParams(
            dimension_semantics=("parallel",),          # megacore on v7x
            vmem_limit_bytes=32 * 1024 * 1024,          # headroom on v5e (16 MiB default)
        ),
    )(x_packed, w_bd, b_smem)

    # packed row r, column q  ==  original row r*P + q  ->  row-major flatten
    score_main = out.reshape(-1)
    if B_main == B:
        return score_main
    return jnp.concatenate([score_main, _xla(score_vec[B_main:])], axis=0)


if __name__ == "__main__":
    in_dim = 32           # feature dim of the Linear(in_dim, 1)
    B = 4096              # exercises the tiled Pallas path (grid of 4 steps)

    key = jax.random.PRNGKey(0)
    k_x, k_w, k_b = jax.random.split(key, 3)

    score_vec = jax.random.normal(k_x, (B, in_dim), dtype=jnp.float32)

    # nn.Linear-style uniform(-1/sqrt(in_dim), 1/sqrt(in_dim)) init
    bound = 1.0 / (in_dim ** 0.5)
    weight = jax.random.uniform(k_w, (in_dim, 1), jnp.float32, -bound, bound)
    bias = jax.random.uniform(k_b, (), jnp.float32, -bound, bound)

    ref = jax.nn.sigmoid(score_vec @ weight + bias).reshape(-1)

    # main path: jitted, tiled Pallas kernel
    fwd = jax.jit(functools.partial(classifier_forward, use_pallas=True))
    score = jax.block_until_ready(fwd(score_vec, weight, bias))
    assert score.shape == (B,)
    assert jnp.allclose(score, ref, atol=2e-5), "mismatch vs reference (tiled path)"

    # ragged batch: exercises the partial trailing packed-row block + XLA tail
    B2 = 3300
    score2 = jax.block_until_ready(
        classifier_forward(score_vec[:B2], weight, bias, use_pallas=True))
    assert score2.shape == (B2,)
    assert jnp.allclose(score2, ref[:B2], atol=2e-5), "mismatch vs reference (ragged)"

    # tiny batch: XLA fallback path
    score3 = jax.block_until_ready(classifier_forward(score_vec[:8], weight, bias))
    assert jnp.allclose(score3, ref[:8], atol=2e-5), "mismatch vs reference (fallback)"

    print("KERNEL_OK")
</pallas_src>

<mosaic_0001>
module attributes {stable_mosaic.version = 11 : i64} {
  func.func @_classifier_kernel(%arg0: i32, %arg1: memref<8x4096xf32, #tpu.memory_space<vmem>>, %arg2: memref<4096x128xf32, #tpu.memory_space<vmem>>, %arg3: memref<1x1xf32, #tpu.memory_space<smem>>, %arg4: memref<8x128xf32, #tpu.memory_space<vmem>>) attributes {dimension_semantics = [#tpu.dimension_semantics<parallel>], iteration_bounds = array<i64: 4>, scalar_prefetch = 0 : i64, scratch_operands = 0 : i64, tpu.core_type = #tpu.core_type<tc>, window_params = [{transform_indices = @transform_0, window_bounds = array<i64: 8, 4096>}, {pipeline_mode = #tpu.pipeline_mode<synchronous>, transform_indices = @transform_1, window_bounds = array<i64: 4096, 128>}, {transform_indices = @transform_2, window_bounds = array<i64: 1, 1>}, {transform_indices = @transform_3, window_bounds = array<i64: 8, 128>}]} {
    %c0 = arith.constant 0 : index
    %c0_0 = arith.constant 0 : index
    %0 = vector.load %arg1[%c0, %c0_0] : memref<8x4096xf32, #tpu.memory_space<vmem>>, vector<8x4096xf32>
    %c0_1 = arith.constant 0 : index
    %c0_2 = arith.constant 0 : index
    %1 = vector.load %arg2[%c0_1, %c0_2] : memref<4096x128xf32, #tpu.memory_space<vmem>>, vector<4096x128xf32>
    %cst = arith.constant dense<0.000000e+00> : vector<8x128xf32>
    %2 = tpu.matmul %0, %1, %cst {dimension_numbers = #tpu.dot_dimension_numbers<[1], [0], [0], [1], [0, 0, 1, 1], [], []>} : vector<8x4096xf32>, vector<4096x128xf32>, vector<8x128xf32> -> vector<8x128xf32>
    %c0_3 = arith.constant 0 : index
    %c0_4 = arith.constant 0 : index
    %3 = memref.load %arg3[%c0_3, %c0_4] : memref<1x1xf32, #tpu.memory_space<smem>>
    %4 = vector.broadcast %3 : f32 to vector<8x128xf32>
    %5 = arith.addf %2, %4 : vector<8x128xf32>
    %6 = arith.negf %5 : vector<8x128xf32>
    %7 = math.exp %6 : vector<8x128xf32>
    %cst_5 = arith.constant 1.000000e+00 : f32
    %8 = vector.broadcast %cst_5 : f32 to vector<8x128xf32>
    %9 = arith.addf %8, %7 : vector<8x128xf32>
    %10 = arith.divf %8, %9 : vector<8x128xf32>
    %c0_6 = arith.constant 0 : index
    %c0_7 = arith.constant 0 : index
    %11 = vector.load %arg4[%c0_6, %c0_7] : memref<8x128xf32, #tpu.memory_space<vmem>>, vector<8x128xf32>
    tpu.vector_store %arg4[%c0_6, %c0_7], %10 {strides = array<i32>} : memref<8x128xf32, #tpu.memory_space<vmem>>, vector<8x128xf32>,
    return
  }
  func.func @transform_0(%arg0: i32) -> (i32, i32) {
    %c0_i32 = arith.constant 0 : i32
    %c0_i32_0 = arith.constant 0 : i32
    return %arg0, %c0_i32 : i32, i32
  }
  func.func @transform_1(%arg0: i32) -> (i32, i32) {
    %c0_i32 = arith.constant 0 : i32
    %c0_i32_0 = arith.constant 0 : i32
    %c0_i32_1 = arith.constant 0 : i32
    return %c0_i32, %c0_i32_0 : i32, i32
  }
  func.func @transform_2(%arg0: i32) -> (i32, i32) {
    %c0_i32 = arith.constant 0 : i32
    %c0_i32_0 = arith.constant 0 : i32
    %c0_i32_1 = arith.constant 0 : i32
    return %c0_i32, %c0_i32_0 : i32, i32
  }
  func.func @transform_3(%arg0: i32) -> (i32, i32) {
    %c0_i32 = arith.constant 0 : i32
    %c0_i32_0 = arith.constant 0 : i32
    return %arg0, %c0_i32 : i32, i32
  }
}

</mosaic_0001>

<bundles_post_ra>
// kernel: classifier_forward.1
= control target key start
LH: loop header
LB: loop body
LE: loop exit
PB: predicated region body
PF: predicated region fallthrough
CT: control target
= control target key end

     0   :  { %s4286_s0 = inlined_call_operand.vmem [shape: f32[32,4096], index: 0, kind: input, shape index: {}]   ;;  %s4287_s1 = inlined_call_operand.vmem [shape: f32[4096,128], index: 1, kind: input, shape index: {}]   ;;  %s4288_s2 = inlined_call_operand.<no memory space> [shape: f32[1,1], index: 2, kind: input, shape index: {}]   ;;  %s4289_s3 = inlined_call_operand.hbm [shape: f32[32,128], index: 3, kind: output, shape index: {}]  }
   0x1   :  { %8 = sst [smem:[#allocation2]] %s4288_s2 }
   0x2   :  { %9 = vsyncpa [#allocation4], 0 }
   0x3   :  { %11 = vsyncpa [#allocation4 + $0x1], 0  ;;  %s2618_s14 = smov 0   ;;  %s2620_s15 = smov 0  }
   0x4   :  { %s2622_s16 = smov 0   ;;  %s2624_s17 = smov 0  }
   0x5 LB: > { %s2639_s2 = sadd.s32 4294967295, %s2592_s17   ;;  %s1916_s18 = sadd.s32 4294967294, %s2592_s17   ;;  %s2592_s17 = sphi %s2624_s17, %s4295_s17   ;;  %s2588_s16 = sphi %s2622_s16, %s4294_s16   ;;  %s2584_s15 = sphi %s2620_s15, %s4293_s15   ;;  %s2580_s14 = sphi %s2618_s14, %s4292_s14  }
   0x6   : > { %s2643_s19 = sadd.s32 1, %s2592_s17   ;;  %s92_s20 = sadd.s32 1, %s2588_s16 }
   0x7   : > { %s89_s21 = ssub.s32 %s2592_s17, %s2643_s19  ;;  %p102_p0 = scmp.ne.s32.totalorder %s2588_s16, %s2584_s15 }
   0x8   : > { %p90_p1 = scmp.eq.s32.totalorder %s89_s21, 0  ;;  %p103_p2 = scmp.eq.s32.totalorder %s2639_s2, 3 }
   0x9   : > { %p108_p3 = scmp.ne.s32.totalorder %s2584_s15, %s2580_s14  ;;  %p109_p4 = scmp.eq.s32.totalorder %s1916_s18, 3 }
   0xa   : > { %s2654_s22 = scalar_select %p90_p1, %s2588_s16, %s92_s20  }
   0xb   : > { %p2656_p5 = por %p103_p2, %p102_p0  ;;  %p2660_p6 = por %p109_p4, %p108_p3 }
   0xc   : > { %p1919_p7 = scmp.ge.s32.totalorder %s2592_s17, 1  ;;  %p141_p8 = scmp.lt.s32.totalorder %s2592_s17, 5 }
   0xe   : > { %p142_p9 = pnand %p1919_p7, %p141_p8 }
   0xf   : > { %p165_p10 = scmp.lt.s32.totalorder (!%p142_p9), %s2639_s2, 3  ;;  %s714_s18 = sld [smem:[#allocation2]] (!%p142_p9) }
  0x10   : > { %145 = sbr.rel (%p142_p9) target bundleno = 540 (0x21c), region = 32  ;;  %s1925_s21 = sshll.u32 (!%p142_p9), %s2639_s2, 7 }
  0x11   : > { %s4251_s28 = scalar_lea.hbm (!%p142_p9), %s4289_s3, %s1925_s21  ;;  %s2594_s5 = smov (!%p142_p9), [#allocation3]  }
  0x12   : > { %s2536_s6 = sshll.u32 (!%p142_p9), %s2594_s5, 4  ;;  %s2537_s6 = int_to_ptr.vmem [resolvable:$false] %s2536_s6 }
  0x15   : > { %v233_v0 = vld [vmem:[%s4287_s1 + $0xf8] sm:$0xff]  ;;  %v232_v4 = vld [vmem:[%s4287_s1 + $0xf0] sm:$0xff]  ;;  %v231_v8 = vld [vmem:[%s4287_s1 + $0xe8] sm:$0xff]  ;;  %s2802_s10 = scalar_select %p165_p10, %s2639_s2, 3 }
  0x16   : > { %v265_v1 = vld [vmem:[%s4287_s1 + $0x1f8] sm:$0xff]  ;;  %1929 = vmatprep.subr.mxu0 %v233_v0  ;;  %v264_v5 = vld [vmem:[%s4287_s1 + $0x1f0] sm:$0xff]  ;;  %v263_v9 = vld [vmem:[%s4287_s1 + $0x1e8] sm:$0xff]  ;;  %s2538_s2 = scalar_lea.vmem %s2537_s6, 256 }
  0x17   : > { %v217_v2 = vld [vmem:[%s4287_s1 + $0x78] sm:$0xff]  ;;  %1964 = vmatprep.subr.mxu1 %v265_v1  ;;  %v216_v6 = vld [vmem:[%s4287_s1 + $0x70] sm:$0xff]  ;;  %v215_v10 = vld [vmem:[%s4287_s1 + $0x68] sm:$0xff]  ;;  %s1928_s8 = sshll.u32 %s2802_s10, 8 }
  0x18   : > { %v249_v3 = vld [vmem:[%s4287_s1 + $0x178] sm:$0xff]  ;;  %1930 = vmatpush3.msra.mxu0 %v217_v2  ;;  %v248_v7 = vld [vmem:[%s4287_s1 + $0x170] sm:$0xff]  ;;  %v247_v11 = vld [vmem:[%s4287_s1 + $0x168] sm:$0xff]  ;;  %s2850_s4 = scalar_lea.vmem %s4286_s0, %s1928_s8 }
  0x19   : > { %1965 = vmatpush3.msra.mxu1 %v249_v3  ;;  %1931 = vmatprep.subr.mxu0 %v232_v4  ;;  %v230_v12 = vld [vmem:[%s4287_s1 + $0xe0] sm:$0xff]  ;;  %v229_v16 = vld [vmem:[%s4287_s1 + $0xd8] sm:$0xff]  ;;  %v228_v20 = vld [vmem:[%s4287_s1 + $0xd0] sm:$0xff] }
  0x1a   : > { %1966 = vmatprep.subr.mxu1 %v264_v5  ;;  %1932 = vmatpush3.msra.mxu0 %v216_v6  ;;  %v262_v13 = vld [vmem:[%s4287_s1 + $0x1e0] sm:$0xff]  ;;  %v261_v17 = vld [vmem:[%s4287_s1 + $0x1d8] sm:$0xff]  ;;  %v260_v21 = vld [vmem:[%s4287_s1 + $0x1d0] sm:$0xff] }
  0x1b   : > { %1967 = vmatpush3.msra.mxu1 %v248_v7  ;;  %1933 = vmatprep.subr.mxu0 %v231_v8  ;;  %v214_v14 = vld [vmem:[%s4287_s1 + $0x60] sm:$0xff]  ;;  %v213_v18 = vld [vmem:[%s4287_s1 + $0x58] sm:$0xff]  ;;  %v212_v22 = vld [vmem:[%s4287_s1 + $0x50] sm:$0xff] }
  0x1c   : > { %1968 = vmatprep.subr.mxu1 %v263_v9  ;;  %v246_v15 = vld [vmem:[%s4287_s1 + $0x160] sm:$0xff]  ;;  %1934 = vmatpush3.msra.mxu0 %v215_v10  ;;  %v245_v19 = vld [vmem:[%s4287_s1 + $0x158] sm:$0xff]  ;;  %v244_v23 = vld [vmem:[%s4287_s1 + $0x150] sm:$0xff] }
  0x1d   : > { %1969 = vmatpush3.msra.mxu1 %v247_v11  ;;  %1935 = vmatprep.subr.mxu0 %v230_v12  ;;  %v227_v24 = vld [vmem:[%s4287_s1 + $0xc8] sm:$0xff]  ;;  %v226_v28 = vld [vmem:[%s4287_s1 + $0xc0] sm:$0xff]  ;;  %v225_v32 = vld [vmem:[%s4287_s1 + $0xb8] sm:$0xff] }
  0x1e   : > { %1970 = vmatprep.subr.mxu1 %v262_v13  ;;  %1936 = vmatpush3.msra.mxu0 %v214_v14  ;;  %v259_v25 = vld [vmem:[%s4287_s1 + $0x1c8] sm:$0xff]  ;;  %v258_v29 = vld [vmem:[%s4287_s1 + $0x1c0] sm:$0xff]  ;;  %v257_v33 = vld [vmem:[%s4287_s1 + $0x1b8] sm:$0xff] }
  0x1f   : > { %1971 = vmatpush3.msra.mxu1 %v246_v15  ;;  %1937 = vmatprep.subr.mxu0 %v229_v16  ;;  %v211_v26 = vld [vmem:[%s4287_s1 + $0x48] sm:$0xff]  ;;  %v210_v30 = vld [vmem:[%s4287_s1 + $0x40] sm:$0xff]  ;;  %v209_v34 = vld [vmem:[%s4287_s1 + $0x38] sm:$0xff] }
  0x20   : > { %1972 = vmatprep.subr.mxu1 %v261_v17  ;;  %1938 = vmatpush3.msra.mxu0 %v213_v18  ;;  %v243_v27 = vld [vmem:[%s4287_s1 + $0x148] sm:$0xff]  ;;  %v242_v31 = vld [vmem:[%s4287_s1 + $0x140] sm:$0xff]  ;;  %v241_v35 = vld [vmem:[%s4287_s1 + $0x138] sm:$0xff] }
  0x21   : > { %1973 = vmatpush3.msra.mxu1 %v245_v19  ;;  %1939 = vmatprep.subr.mxu0 %v228_v20  ;;  %v224_v36 = vld [vmem:[%s4287_s1 + $0xb0] sm:$0xff]  ;;  %v223_v40 = vld [vmem:[%s4287_s1 + $0xa8] sm:$0xff]  ;;  %v222_v44 = vld [vmem:[%s4287_s1 + $0xa0] sm:$0xff] }
  0x22   : > { %1974 = vmatprep.subr.mxu1 %v260_v21  ;;  %1940 = vmatpush3.msra.mxu0 %v212_v22  ;;  %v256_v37 = vld [vmem:[%s4287_s1 + $0x1b0] sm:$0xff]  ;;  %v255_v41 = vld [vmem:[%s4287_s1 + $0x1a8] sm:$0xff]  ;;  %v254_v45 = vld [vmem:[%s4287_s1 + $0x1a0] sm:$0xff] }
  0x23   : > { %1975 = vmatpush3.msra.mxu1 %v244_v23  ;;  %1941 = vmatprep.subr.mxu0 %v227_v24  ;;  %v208_v38 = vld [vmem:[%s4287_s1 + $0x30] sm:$0xff]  ;;  %v207_v42 = vld [vmem:[%s4287_s1 + $0x28] sm:$0xff]  ;;  %v206_v46 = vld [vmem:[%s4287_s1 + $0x20] sm:$0xff] }
  0x24   : > { %1976 = vmatprep.subr.mxu1 %v259_v25  ;;  %1942 = vmatpush3.msra.mxu0 %v211_v26  ;;  %v240_v39 = vld [vmem:[%s4287_s1 + $0x130] sm:$0xff]  ;;  %v239_v43 = vld [vmem:[%s4287_s1 + $0x128] sm:$0xff]  ;;  %v238_v47 = vld [vmem:[%s4287_s1 + $0x120] sm:$0xff] }
  0x25   : > { %1977 = vmatpush3.msra.mxu1 %v243_v27  ;;  %1943 = vmatprep.subr.mxu0 %v226_v28  ;;  %v221_v48 = vld [vmem:[%s4287_s1 + $0x98] sm:$0xff]  ;;  %v220_v52 = vld [vmem:[%s4287_s1 + $0x90] sm:$0xff]  ;;  %v219_v56 = vld [vmem:[%s4287_s1 + $0x88] sm:$0xff] }
  0x26   : > { %1978 = vmatprep.subr.mxu1 %v258_v29  ;;  %1944 = vmatpush3.msra.mxu0 %v210_v30  ;;  %v253_v49 = vld [vmem:[%s4287_s1 + $0x198] sm:$0xff]  ;;  %v252_v53 = vld [vmem:[%s4287_s1 + $0x190] sm:$0xff]  ;;  %v251_v57 = vld [vmem:[%s4287_s1 + $0x188] sm:$0xff] }
  0x27   : > { %1979 = vmatpush3.msra.mxu1 %v242_v31  ;;  %1945 = vmatprep.subr.mxu0 %v225_v32  ;;  %v205_v50 = vld [vmem:[%s4287_s1 + $0x18] sm:$0xff]  ;;  %v204_v54 = vld [vmem:[%s4287_s1 + $0x10] sm:$0xff]  ;;  %v203_v58 = vld [vmem:[%s4287_s1 + $0x8] sm:$0xff] }
  0x28   : > { %1980 = vmatprep.subr.mxu1 %v257_v33  ;;  %1946 = vmatpush3.msra.mxu0 %v209_v34  ;;  %v237_v51 = vld [vmem:[%s4287_s1 + $0x118] sm:$0xff]  ;;  %v236_v55 = vld [vmem:[%s4287_s1 + $0x110] sm:$0xff]  ;;  %v235_v59 = vld [vmem:[%s4287_s1 + $0x108] sm:$0xff] }
  0x29   : > { %1981 = vmatpush3.msra.mxu1 %v241_v35  ;;  %1947 = vmatprep.subr.mxu0 %v224_v36  ;;  %v218_v60 = vld [vmem:[%s4287_s1 + $0x80] sm:$0xff]  ;;  %v171_v63 = vld [vmem:[%s2850_s4 + $0x8] sm:$0xff]  ;;  %v173_v2 = vld [vmem:[%s2850_s4 + $0x18] sm:$0xff] }
  0x2a   : > { %1982 = vmatprep.subr.mxu1 %v256_v37  ;;  %1948 = vmatpush3.msra.mxu0 %v208_v38  ;;  %v250_v61 = vld [vmem:[%s4287_s1 + $0x180] sm:$0xff]  ;;  %v297_v3 = vld [vmem:[%s4287_s1 + $0x2f8] sm:$0xff]  ;;  %v172_v5 = vld [vmem:[%s2850_s4 + $0x10] sm:$0xff] }
  0x2b   : > { %1983 = vmatpush3.msra.mxu1 %v240_v39  ;;  %1949 = vmatprep.subr.mxu0 %v223_v40  ;;  %v202_v62 = vld [vmem:[%s4287_s1] sm:$0xff]  ;;  %v329_v4 = vld [vmem:[%s4287_s1 + $0x3f8] sm:$0xff]  ;;  %v296_v8 = vld [vmem:[%s4287_s1 + $0x2f0] sm:$0xff] }
  0x2c   : > { %1984 = vmatprep.subr.mxu1 %v255_v41  ;;  %1950 = vmatpush3.msra.mxu0 %v207_v42  ;;  %v234_v0 = vld [vmem:[%s4287_s1 + $0x100] sm:$0xff]  ;;  %v281_v6 = vld [vmem:[%s4287_s1 + $0x278] sm:$0xff]  ;;  %v328_v9 = vld [vmem:[%s4287_s1 + $0x3f0] sm:$0xff] }
  0x2d   : > { %1985 = vmatpush3.msra.mxu1 %v239_v43  ;;  %1951 = vmatprep.subr.mxu0 %v222_v44  ;;  %v170_v1 = vld [vmem:[%s2850_s4] sm:$0xff]  ;;  %v313_v7 = vld [vmem:[%s4287_s1 + $0x378] sm:$0xff]  ;;  %v280_v10 = vld [vmem:[%s4287_s1 + $0x270] sm:$0xff] }
  0x2e   : > { %1986 = vmatprep.subr.mxu1 %v254_v45  ;;  %1952 = vmatpush3.msra.mxu0 %v206_v46  ;;  %v312_v11 = vld [vmem:[%s4287_s1 + $0x370] sm:$0xff]  ;;  %v295_v12 = vld [vmem:[%s4287_s1 + $0x2e8] sm:$0xff]  ;;  %v294_v16 = vld [vmem:[%s4287_s1 + $0x2e0] sm:$0xff] }
  0x2f   : > { %1987 = vmatpush3.msra.mxu1 %v238_v47  ;;  %1953 = vmatprep.subr.mxu0 %v221_v48  ;;  %v327_v13 = vld [vmem:[%s4287_s1 + $0x3e8] sm:$0xff]  ;;  %v326_v17 = vld [vmem:[%s4287_s1 + $0x3e0] sm:$0xff]  ;;  %v293_v20 = vld [vmem:[%s4287_s1 + $0x2d8] sm:$0xff] }
  0x30   : > { %1988 = vmatprep.subr.mxu1 %v253_v49  ;;  %1954 = vmatpush3.msra.mxu0 %v205_v50  ;;  %v279_v14 = vld [vmem:[%s4287_s1 + $0x268] sm:$0xff]  ;;  %v278_v18 = vld [vmem:[%s4287_s1 + $0x260] sm:$0xff]  ;;  %v325_v21 = vld [vmem:[%s4287_s1 + $0x3d8] sm:$0xff] }
  0x31   : > { %1989 = vmatpush3.msra.mxu1 %v237_v51  ;;  %1955 = vmatprep.subr.mxu0 %v220_v52  ;;  %v311_v15 = vld [vmem:[%s4287_s1 + $0x368] sm:$0xff]  ;;  %v310_v19 = vld [vmem:[%s4287_s1 + $0x360] sm:$0xff]  ;;  %v277_v22 = vld [vmem:[%s4287_s1 + $0x258] sm:$0xff] }
  0x32   : > { %1990 = vmatprep.subr.mxu1 %v252_v53  ;;  %1956 = vmatpush3.msra.mxu0 %v204_v54  ;;  %v309_v23 = vld [vmem:[%s4287_s1 + $0x358] sm:$0xff]  ;;  %v292_v24 = vld [vmem:[%s4287_s1 + $0x2d0] sm:$0xff]  ;;  %v291_v28 = vld [vmem:[%s4287_s1 + $0x2c8] sm:$0xff] }
  0x33   : > { %1991 = vmatpush3.msra.mxu1 %v236_v55  ;;  %1957 = vmatprep.subr.mxu0 %v219_v56  ;;  %v324_v25 = vld [vmem:[%s4287_s1 + $0x3d0] sm:$0xff]  ;;  %v323_v29 = vld [vmem:[%s4287_s1 + $0x3c8] sm:$0xff]  ;;  %v290_v32 = vld [vmem:[%s4287_s1 + $0x2c0] sm:$0xff] }
  0x34   : > { %1992 = vmatprep.subr.mxu1 %v251_v57  ;;  %1958 = vmatpush3.msra.mxu0 %v203_v58  ;;  %v276_v26 = vld [vmem:[%s4287_s1 + $0x250] sm:$0xff]  ;;  %v275_v30 = vld [vmem:[%s4287_s1 + $0x248] sm:$0xff]  ;;  %v322_v33 = vld [vmem:[%s4287_s1 + $0x3c0] sm:$0xff] }
  0x35   : > { %1993 = vmatpush3.msra.mxu1 %v235_v59  ;;  %1959 = vmatprep.subr.mxu0 %v218_v60  ;;  %v308_v27 = vld [vmem:[%s4287_s1 + $0x350] sm:$0xff]  ;;  %v307_v31 = vld [vmem:[%s4287_s1 + $0x348] sm:$0xff]  ;;  %v274_v34 = vld [vmem:[%s4287_s1 + $0x240] sm:$0xff] }
  0x36   : > { %1994 = vmatprep.subr.mxu1 %v250_v61  ;;  %1960 = vmatpush3.msra.mxu0 %v202_v62  ;;  %v306_v35 = vld [vmem:[%s4287_s1 + $0x340] sm:$0xff]  ;;  %v289_v36 = vld [vmem:[%s4287_s1 + $0x2b8] sm:$0xff]  ;;  %v288_v40 = vld [vmem:[%s4287_s1 + $0x2b0] sm:$0xff] }
  0x37   : > { %780 = vmatprep.mubr.f32.mxu0 %v171_v63  ;;  %1995 = vmatpush3.msra.mxu1 %v234_v0  ;;  %v321_v37 = vld [vmem:[%s4287_s1 + $0x3b8] sm:$0xff]  ;;  %v320_v41 = vld [vmem:[%s4287_s1 + $0x3b0] sm:$0xff]  ;;  %v287_v44 = vld [vmem:[%s4287_s1 + $0x2a8] sm:$0xff] }
  0x38   : > { %781 = vmatmul.mubr.f32.vlgmr.msra.gmra.mxu0 %v170_v1  ;;  %850 = vmatprep.mubr.f32.mxu1 %v173_v2  ;;  %v273_v38 = vld [vmem:[%s4287_s1 + $0x238] sm:$0xff]  ;;  %v272_v42 = vld [vmem:[%s4287_s1 + $0x230] sm:$0xff]  ;;  %v319_v45 = vld [vmem:[%s4287_s1 + $0x3a8] sm:$0xff] }
  0x39   : > { %1999 = vmatprep.subr.mxu0 %v297_v3  ;;  %2034 = vmatprep.subr.mxu1 %v329_v4  ;;  %v305_v39 = vld [vmem:[%s4287_s1 + $0x338] sm:$0xff]  ;;  %v304_v43 = vld [vmem:[%s4287_s1 + $0x330] sm:$0xff]  ;;  %v271_v46 = vld [vmem:[%s4287_s1 + $0x228] sm:$0xff] }
  0x3a   : > { %851 = vmatmul.mubr.f32.vlgmr.msra.gmra.mxu1 %v172_v5  ;;  %2000 = vmatpush3.msra.mxu0 %v281_v6  ;;  %v303_v47 = vld [vmem:[%s4287_s1 + $0x328] sm:$0xff]  ;;  %v286_v48 = vld [vmem:[%s4287_s1 + $0x2a0] sm:$0xff]  ;;  %v285_v52 = vld [vmem:[%s4287_s1 + $0x298] sm:$0xff] }
  0x3b   : > { %2035 = vmatpush3.msra.mxu1 %v313_v7  ;;  %2001 = vmatprep.subr.mxu0 %v296_v8  ;;  %v318_v49 = vld [vmem:[%s4287_s1 + $0x3a0] sm:$0xff]  ;;  %v317_v53 = vld [vmem:[%s4287_s1 + $0x398] sm:$0xff]  ;;  %v284_v56 = vld [vmem:[%s4287_s1 + $0x290] sm:$0xff] }
  0x3c   : > { %2036 = vmatprep.subr.mxu1 %v328_v9  ;;  %2002 = vmatpush3.msra.mxu0 %v280_v10  ;;  %v270_v50 = vld [vmem:[%s4287_s1 + $0x220] sm:$0xff]  ;;  %v269_v54 = vld [vmem:[%s4287_s1 + $0x218] sm:$0xff]  ;;  %v316_v57 = vld [vmem:[%s4287_s1 + $0x390] sm:$0xff] }
  0x3d   : > { %2037 = vmatpush3.msra.mxu1 %v312_v11  ;;  %2003 = vmatprep.subr.mxu0 %v295_v12  ;;  %v302_v51 = vld [vmem:[%s4287_s1 + $0x320] sm:$0xff]  ;;  %v301_v55 = vld [vmem:[%s4287_s1 + $0x318] sm:$0xff]  ;;  %v268_v58 = vld [vmem:[%s4287_s1 + $0x210] sm:$0xff] }
  0x3e   : > { %2038 = vmatprep.subr.mxu1 %v327_v13  ;;  %2004 = vmatpush3.msra.mxu0 %v279_v14  ;;  %v300_v59 = vld [vmem:[%s4287_s1 + $0x310] sm:$0xff]  ;;  %v283_v60 = vld [vmem:[%s4287_s1 + $0x288] sm:$0xff]  ;;  %v282_v0 = vld [vmem:[%s4287_s1 + $0x280] sm:$0xff] }
  0x3f   : > { %2039 = vmatpush3.msra.mxu1 %v311_v15  ;;  %2005 = vmatprep.subr.mxu0 %v294_v16  ;;  %v315_v61 = vld [vmem:[%s4287_s1 + $0x388] sm:$0xff]  ;;  %v314_v1 = vld [vmem:[%s4287_s1 + $0x380] sm:$0xff]  ;;  %v177_v6 = vld [vmem:[%s2850_s4 + $0x38] sm:$0xff] }
  0x40   : > { %2040 = vmatprep.subr.mxu1 %v326_v17  ;;  %2006 = vmatpush3.msra.mxu0 %v278_v18  ;;  %v267_v62 = vld [vmem:[%s4287_s1 + $0x208] sm:$0xff]  ;;  %v266_v2 = vld [vmem:[%s4287_s1 + $0x200] sm:$0xff]  ;;  %v361_v7 = vld [vmem:[%s4287_s1 + $0x4f8] sm:$0xff] }
  0x41   : > { %2041 = vmatpush3.msra.mxu1 %v310_v19  ;;  %2007 = vmatprep.subr.mxu0 %v293_v20  ;;  %v299_v63 = vld [vmem:[%s4287_s1 + $0x308] sm:$0xff]  ;;  %v298_v4 = vld [vmem:[%s4287_s1 + $0x300] sm:$0xff]  ;;  %v393_v8 = vld [vmem:[%s4287_s1 + $0x5f8] sm:$0xff] }
  0x42   : > { %2042 = vmatprep.subr.mxu1 %v325_v21  ;;  %2008 = vmatpush3.msra.mxu0 %v277_v22  ;;  %v175_v3 = vld [vmem:[%s2850_s4 + $0x28] sm:$0xff]  ;;  %v174_v5 = vld [vmem:[%s2850_s4 + $0x20] sm:$0xff]  ;;  %v176_v9 = vld [vmem:[%s2850_s4 + $0x30] sm:$0xff] }
  0x43   : > { %2043 = vmatpush3.msra.mxu1 %v309_v23  ;;  %2009 = vmatprep.subr.mxu0 %v292_v24  ;;  %v345_v10 = vld [vmem:[%s4287_s1 + $0x478] sm:$0xff]  ;;  %v360_v12 = vld [vmem:[%s4287_s1 + $0x4f0] sm:$0xff]  ;;  %v359_v16 = vld [vmem:[%s4287_s1 + $0x4e8] sm:$0xff] }
  0x44   : > { %2044 = vmatprep.subr.mxu1 %v324_v25  ;;  %2010 = vmatpush3.msra.mxu0 %v276_v26  ;;  %v377_v11 = vld [vmem:[%s4287_s1 + $0x578] sm:$0xff]  ;;  %v392_v13 = vld [vmem:[%s4287_s1 + $0x5f0] sm:$0xff]  ;;  %v391_v17 = vld [vmem:[%s4287_s1 + $0x5e8] sm:$0xff] }
  0x45   : > { %2045 = vmatpush3.msra.mxu1 %v308_v27  ;;  %2011 = vmatprep.subr.mxu0 %v291_v28  ;;  %v344_v14 = vld [vmem:[%s4287_s1 + $0x470] sm:$0xff]  ;;  %v343_v18 = vld [vmem:[%s4287_s1 + $0x468] sm:$0xff]  ;;  %v358_v20 = vld [vmem:[%s4287_s1 + $0x4e0] sm:$0xff] }
  0x46   : > { %2046 = vmatprep.subr.mxu1 %v323_v29  ;;  %2012 = vmatpush3.msra.mxu0 %v275_v30  ;;  %v376_v15 = vld [vmem:[%s4287_s1 + $0x570] sm:$0xff]  ;;  %v375_v19 = vld [vmem:[%s4287_s1 + $0x568] sm:$0xff]  ;;  %v390_v21 = vld [vmem:[%s4287_s1 + $0x5e0] sm:$0xff] }
  0x47   : > { %2047 = vmatpush3.msra.mxu1 %v307_v31  ;;  %2013 = vmatprep.subr.mxu0 %v290_v32  ;;  %v342_v22 = vld [vmem:[%s4287_s1 + $0x460] sm:$0xff]  ;;  %v357_v24 = vld [vmem:[%s4287_s1 + $0x4d8] sm:$0xff]  ;;  %v356_v28 = vld [vmem:[%s4287_s1 + $0x4d0] sm:$0xff] }
  0x48   : > { %2048 = vmatprep.subr.mxu1 %v322_v33  ;;  %2014 = vmatpush3.msra.mxu0 %v274_v34  ;;  %v374_v23 = vld [vmem:[%s4287_s1 + $0x560] sm:$0xff]  ;;  %v389_v25 = vld [vmem:[%s4287_s1 + $0x5d8] sm:$0xff]  ;;  %v388_v29 = vld [vmem:[%s4287_s1 + $0x5d0] sm:$0xff] }
  0x49   : > { %2049 = vmatpush3.msra.mxu1 %v306_v35  ;;  %2015 = vmatprep.subr.mxu0 %v289_v36  ;;  %v341_v26 = vld [vmem:[%s4287_s1 + $0x458] sm:$0xff]  ;;  %v340_v30 = vld [vmem:[%s4287_s1 + $0x450] sm:$0xff]  ;;  %v355_v32 = vld [vmem:[%s4287_s1 + $0x4c8] sm:$0xff] }
  0x4a   : > { %2050 = vmatprep.subr.mxu1 %v321_v37  ;;  %2016 = vmatpush3.msra.mxu0 %v273_v38  ;;  %v373_v27 = vld [vmem:[%s4287_s1 + $0x558] sm:$0xff]  ;;  %v372_v31 = vld [vmem:[%s4287_s1 + $0x550] sm:$0xff]  ;;  %v387_v33 = vld [vmem:[%s4287_s1 + $0x5c8] sm:$0xff] }
  0x4b   : > { %2051 = vmatpush3.msra.mxu1 %v305_v39  ;;  %2017 = vmatprep.subr.mxu0 %v288_v40  ;;  %v339_v34 = vld [vmem:[%s4287_s1 + $0x448] sm:$0xff]  ;;  %v354_v36 = vld [vmem:[%s4287_s1 + $0x4c0] sm:$0xff]  ;;  %v353_v40 = vld [vmem:[%s4287_s1 + $0x4b8] sm:$0xff] }
  0x4c   : > { %2052 = vmatprep.subr.mxu1 %v320_v41  ;;  %2018 = vmatpush3.msra.mxu0 %v272_v42  ;;  %v371_v35 = vld [vmem:[%s4287_s1 + $0x548] sm:$0xff]  ;;  %v386_v37 = vld [vmem:[%s4287_s1 + $0x5c0] sm:$0xff]  ;;  %v385_v41 = vld [vmem:[%s4287_s1 + $0x5b8] sm:$0xff] }
  0x4d   : > { %2053 = vmatpush3.msra.mxu1 %v304_v43  ;;  %2019 = vmatprep.subr.mxu0 %v287_v44  ;;  %v338_v38 = vld [vmem:[%s4287_s1 + $0x440] sm:$0xff]  ;;  %v337_v42 = vld [vmem:[%s4287_s1 + $0x438] sm:$0xff]  ;;  %v352_v44 = vld [vmem:[%s4287_s1 + $0x4b0] sm:$0xff] }
  0x4e   : > { %2054 = vmatprep.subr.mxu1 %v319_v45  ;;  %2020 = vmatpush3.msra.mxu0 %v271_v46  ;;  %v370_v39 = vld [vmem:[%s4287_s1 + $0x540] sm:$0xff]  ;;  %v369_v43 = vld [vmem:[%s4287_s1 + $0x538] sm:$0xff]  ;;  %v384_v45 = vld [vmem:[%s4287_s1 + $0x5b0] sm:$0xff] }
  0x4f   : > { %2055 = vmatpush3.msra.mxu1 %v303_v47  ;;  %2021 = vmatprep.subr.mxu0 %v286_v48  ;;  %v336_v46 = vld [vmem:[%s4287_s1 + $0x430] sm:$0xff]  ;;  %v351_v48 = vld [vmem:[%s4287_s1 + $0x4a8] sm:$0xff] }
  0x50   : > { %2056 = vmatprep.subr.mxu1 %v318_v49  ;;  %2022 = vmatpush3.msra.mxu0 %v270_v50  ;;  %v368_v47 = vld [vmem:[%s4287_s1 + $0x530] sm:$0xff]  ;;  %v383_v49 = vld [vmem:[%s4287_s1 + $0x5a8] sm:$0xff] }
  0x51   : > { %2057 = vmatpush3.msra.mxu1 %v302_v51  ;;  %2023 = vmatprep.subr.mxu0 %v285_v52  ;;  %v335_v50 = vld [vmem:[%s4287_s1 + $0x428] sm:$0xff]  ;;  %v350_v52 = vld [vmem:[%s4287_s1 + $0x4a0] sm:$0xff] }
  0x52   : > { %2058 = vmatprep.subr.mxu1 %v317_v53  ;;  %2024 = vmatpush3.msra.mxu0 %v269_v54  ;;  %v367_v51 = vld [vmem:[%s4287_s1 + $0x528] sm:$0xff]  ;;  %v382_v53 = vld [vmem:[%s4287_s1 + $0x5a0] sm:$0xff] }
  0x53   : > { %2059 = vmatpush3.msra.mxu1 %v301_v55  ;;  %2025 = vmatprep.subr.mxu0 %v284_v56  ;;  %v334_v54 = vld [vmem:[%s4287_s1 + $0x420] sm:$0xff]  ;;  %v349_v56 = vld [vmem:[%s4287_s1 + $0x498] sm:$0xff] }
  0x54   : > { %2060 = vmatprep.subr.mxu1 %v316_v57  ;;  %2026 = vmatpush3.msra.mxu0 %v268_v58  ;;  %v366_v55 = vld [vmem:[%s4287_s1 + $0x520] sm:$0xff]  ;;  %v381_v57 = vld [vmem:[%s4287_s1 + $0x598] sm:$0xff] }
  0x55   : > { %2061 = vmatpush3.msra.mxu1 %v300_v59  ;;  %2027 = vmatprep.subr.mxu0 %v283_v60  ;;  %v333_v58 = vld [vmem:[%s4287_s1 + $0x418] sm:$0xff]  ;;  %v348_v60 = vld [vmem:[%s4287_s1 + $0x490] sm:$0xff] }
  0x56   : > { %2062 = vmatprep.subr.mxu1 %v315_v61  ;;  %2028 = vmatpush3.msra.mxu0 %v267_v62  ;;  %v365_v59 = vld [vmem:[%s4287_s1 + $0x518] sm:$0xff]  ;;  %v380_v61 = vld [vmem:[%s4287_s1 + $0x590] sm:$0xff] }
  0x57   : > { %2063 = vmatpush3.msra.mxu1 %v299_v63  ;;  %2029 = vmatprep.subr.mxu0 %v282_v0  ;;  %v332_v62 = vld [vmem:[%s4287_s1 + $0x410] sm:$0xff]  ;;  %v347_v0 = vld [vmem:[%s4287_s1 + $0x488] sm:$0xff] }
  0x58   : > { %2064 = vmatprep.subr.mxu1 %v314_v1  ;;  %2030 = vmatpush3.msra.mxu0 %v266_v2  ;;  %v364_v63 = vld [vmem:[%s4287_s1 + $0x510] sm:$0xff]  ;;  %v379_v1 = vld [vmem:[%s4287_s1 + $0x588] sm:$0xff] }
  0x59   : > { %920 = vmatprep.mubr.f32.mxu0 %v175_v3  ;;  %2065 = vmatpush3.msra.mxu1 %v298_v4  ;;  %v331_v2 = vld [vmem:[%s4287_s1 + $0x408] sm:$0xff]  ;;  %v346_v4 = vld [vmem:[%s4287_s1 + $0x480] sm:$0xff] }
  0x5a   : > { %921 = vmatmul.mubr.f32.vlgmr.msra.gmra.mxu0 %v174_v5  ;;  %990 = vmatprep.mubr.f32.mxu1 %v177_v6  ;;  %v363_v3 = vld [vmem:[%s4287_s1 + $0x508] sm:$0xff]  ;;  %v378_v5 = vld [vmem:[%s4287_s1 + $0x580] sm:$0xff] }
  0x5b   : > { %2069 = vmatprep.subr.mxu0 %v361_v7  ;;  %2104 = vmatprep.subr.mxu1 %v393_v8  ;;  %v330_v6 = vld [vmem:[%s4287_s1 + $0x400] sm:$0xff]  ;;  %v179_v7 = vld [vmem:[%s2850_s4 + $0x48] sm:$0xff] }
  0x5c   : > { %991 = vmatmul.mubr.f32.vlgmr.msra.gmra.mxu1 %v176_v9  ;;  %2070 = vmatpush3.msra.mxu0 %v345_v10  ;;  %v362_v8 = vld [vmem:[%s4287_s1 + $0x500] sm:$0xff]  ;;  %v181_v10 = vld [vmem:[%s2850_s4 + $0x58] sm:$0xff] }
  0x5d   : > { %2105 = vmatpush3.msra.mxu1 %v377_v11  ;;  %2071 = vmatprep.subr.mxu0 %v360_v12  ;;  %v178_v9 = vld [vmem:[%s2850_s4 + $0x40] sm:$0xff]  ;;  %v425_v11 = vld [vmem:[%s4287_s1 + $0x6f8] sm:$0xff] }
  0x5e   : > { %2106 = vmatprep.subr.mxu1 %v392_v13  ;;  %2072 = vmatpush3.msra.mxu0 %v344_v14  ;;  %v457_v12 = vld [vmem:[%s4287_s1 + $0x7f8] sm:$0xff]  ;;  %v180_v13 = vld [vmem:[%s2850_s4 + $0x50] sm:$0xff] }
  0x5f   : > { %2107 = vmatpush3.msra.mxu1 %v376_v15  ;;  %2073 = vmatprep.subr.mxu0 %v359_v16  ;;  %v409_v14 = vld [vmem:[%s4287_s1 + $0x678] sm:$0xff]  ;;  %v424_v16 = vld [vmem:[%s4287_s1 + $0x6f0] sm:$0xff] }
  0x60   : > { %2108 = vmatprep.subr.mxu1 %v391_v17  ;;  %2074 = vmatpush3.msra.mxu0 %v343_v18  ;;  %v441_v15 = vld [vmem:[%s4287_s1 + $0x778] sm:$0xff]  ;;  %v456_v17 = vld [vmem:[%s4287_s1 + $0x7f0] sm:$0xff] }
  0x61   : > { %2109 = vmatpush3.msra.mxu1 %v375_v19  ;;  %2075 = vmatprep.subr.mxu0 %v358_v20  ;;  %v408_v18 = vld [vmem:[%s4287_s1 + $0x670] sm:$0xff]  ;;  %v423_v20 = vld [vmem:[%s4287_s1 + $0x6e8] sm:$0xff] }
  0x62   : > { %2110 = vmatprep.subr.mxu1 %v390_v21  ;;  %2076 = vmatpush3.msra.mxu0 %v342_v22  ;;  %v440_v19 = vld [vmem:[%s4287_s1 + $0x770] sm:$0xff]  ;;  %v455_v21 = vld [vmem:[%s4287_s1 + $0x7e8] sm:$0xff] }
  0x63   : > { %2111 = vmatpush3.msra.mxu1 %v374_v23  ;;  %2077 = vmatprep.subr.mxu0 %v357_v24  ;;  %v407_v22 = vld [vmem:[%s4287_s1 + $0x668] sm:$0xff]  ;;  %v422_v24 = vld [vmem:[%s4287_s1 + $0x6e0] sm:$0xff] }
  0x64   : > { %2112 = vmatprep.subr.mxu1 %v389_v25  ;;  %2078 = vmatpush3.msra.mxu0 %v341_v26  ;;  %v439_v23 = vld [vmem:[%s4287_s1 + $0x768] sm:$0xff]  ;;  %v454_v25 = vld [vmem:[%s4287_s1 + $0x7e0] sm:$0xff] }
  0x65   : > { %2113 = vmatpush3.msra.mxu1 %v373_v27  ;;  %2079 = vmatprep.subr.mxu0 %v356_v28  ;;  %v406_v26 = vld [vmem:[%s4287_s1 + $0x660] sm:$0xff]  ;;  %v421_v28 = vld [vmem:[%s4287_s1 + $0x6d8] sm:$0xff] }
  0x66   : > { %2114 = vmatprep.subr.mxu1 %v388_v29  ;;  %2080 = vmatpush3.msra.mxu0 %v340_v30  ;;  %v438_v27 = vld [vmem:[%s4287_s1 + $0x760] sm:$0xff]  ;;  %v453_v29 = vld [vmem:[%s4287_s1 + $0x7d8] sm:$0xff] }
  0x67   : > { %2115 = vmatpush3.msra.mxu1 %v372_v31  ;;  %2081 = vmatprep.subr.mxu0 %v355_v32  ;;  %v405_v30 = vld [vmem:[%s4287_s1 + $0x658] sm:$0xff]  ;;  %v420_v32 = vld [vmem:[%s4287_s1 + $0x6d0] sm:$0xff] }
  0x68   : > { %2116 = vmatprep.subr.mxu1 %v387_v33  ;;  %2082 = vmatpush3.msra.mxu0 %v339_v34  ;;  %v437_v31 = vld [vmem:[%s4287_s1 + $0x758] sm:$0xff]  ;;  %v452_v33 = vld [vmem:[%s4287_s1 + $0x7d0] sm:$0xff] }
  0x69   : > { %2117 = vmatpush3.msra.mxu1 %v371_v35  ;;  %2083 = vmatprep.subr.mxu0 %v354_v36  ;;  %v404_v34 = vld [vmem:[%s4287_s1 + $0x650] sm:$0xff]  ;;  %v419_v36 = vld [vmem:[%s4287_s1 + $0x6c8] sm:$0xff] }
  0x6a   : > { %2118 = vmatprep.subr.mxu1 %v386_v37  ;;  %2084 = vmatpush3.msra.mxu0 %v338_v38  ;;  %v436_v35 = vld [vmem:[%s4287_s1 + $0x750] sm:$0xff]  ;;  %v451_v37 = vld [vmem:[%s4287_s1 + $0x7c8] sm:$0xff] }
  0x6b   : > { %2119 = vmatpush3.msra.mxu1 %v370_v39  ;;  %2085 = vmatprep.subr.mxu0 %v353_v40  ;;  %v403_v38 = vld [vmem:[%s4287_s1 + $0x648] sm:$0xff]  ;;  %v418_v40 = vld [vmem:[%s4287_s1 + $0x6c0] sm:$0xff] }
  0x6c   : > { %2120 = vmatprep.subr.mxu1 %v385_v41  ;;  %2086 = vmatpush3.msra.mxu0 %v337_v42  ;;  %v435_v39 = vld [vmem:[%s4287_s1 + $0x748] sm:$0xff]  ;;  %v450_v41 = vld [vmem:[%s4287_s1 + $0x7c0] sm:$0xff] }
  0x6d   : > { %2121 = vmatpush3.msra.mxu1 %v369_v43  ;;  %2087 = vmatprep.subr.mxu0 %v352_v44  ;;  %v402_v42 = vld [vmem:[%s4287_s1 + $0x640] sm:$0xff]  ;;  %v417_v44 = vld [vmem:[%s4287_s1 + $0x6b8] sm:$0xff] }
  0x6e   : > { %2122 = vmatprep.subr.mxu1 %v384_v45  ;;  %2088 = vmatpush3.msra.mxu0 %v336_v46  ;;  %v434_v43 = vld [vmem:[%s4287_s1 + $0x740] sm:$0xff]  ;;  %v449_v45 = vld [vmem:[%s4287_s1 + $0x7b8] sm:$0xff] }
  0x6f   : > { %2123 = vmatpush3.msra.mxu1 %v368_v47  ;;  %2089 = vmatprep.subr.mxu0 %v351_v48  ;;  %v401_v46 = vld [vmem:[%s4287_s1 + $0x638] sm:$0xff]  ;;  %v416_v48 = vld [vmem:[%s4287_s1 + $0x6b0] sm:$0xff] }
  0x70   : > { %2124 = vmatprep.subr.mxu1 %v383_v49  ;;  %2090 = vmatpush3.msra.mxu0 %v335_v50  ;;  %v433_v47 = vld [vmem:[%s4287_s1 + $0x738] sm:$0xff]  ;;  %v448_v49 = vld [vmem:[%s4287_s1 + $0x7b0] sm:$0xff] }
  0x71   : > { %2125 = vmatpush3.msra.mxu1 %v367_v51  ;;  %2091 = vmatprep.subr.mxu0 %v350_v52  ;;  %v400_v50 = vld [vmem:[%s4287_s1 + $0x630] sm:$0xff]  ;;  %v415_v52 = vld [vmem:[%s4287_s1 + $0x6a8] sm:$0xff] }
  0x72   : > { %2126 = vmatprep.subr.mxu1 %v382_v53  ;;  %2092 = vmatpush3.msra.mxu0 %v334_v54  ;;  %v432_v51 = vld [vmem:[%s4287_s1 + $0x730] sm:$0xff]  ;;  %v447_v53 = vld [vmem:[%s4287_s1 + $0x7a8] sm:$0xff] }
  0x73   : > { %2127 = vmatpush3.msra.mxu1 %v366_v55  ;;  %2093 = vmatprep.subr.mxu0 %v349_v56  ;;  %v399_v54 = vld [vmem:[%s4287_s1 + $0x628] sm:$0xff]  ;;  %v414_v56 = vld [vmem:[%s4287_s1 + $0x6a0] sm:$0xff] }
  0x74   : > { %2128 = vmatprep.subr.mxu1 %v381_v57  ;;  %2094 = vmatpush3.msra.mxu0 %v333_v58  ;;  %v431_v55 = vld [vmem:[%s4287_s1 + $0x728] sm:$0xff]  ;;  %v446_v57 = vld [vmem:[%s4287_s1 + $0x7a0] sm:$0xff] }
  0x75   : > { %2129 = vmatpush3.msra.mxu1 %v365_v59  ;;  %2095 = vmatprep.subr.mxu0 %v348_v60  ;;  %v398_v58 = vld [vmem:[%s4287_s1 + $0x620] sm:$0xff]  ;;  %v413_v60 = vld [vmem:[%s4287_s1 + $0x698] sm:$0xff] }
  0x76   : > { %2130 = vmatprep.subr.mxu1 %v380_v61  ;;  %2096 = vmatpush3.msra.mxu0 %v332_v62  ;;  %v430_v59 = vld [vmem:[%s4287_s1 + $0x720] sm:$0xff]  ;;  %v445_v61 = vld [vmem:[%s4287_s1 + $0x798] sm:$0xff] }
  0x77   : > { %2131 = vmatpush3.msra.mxu1 %v364_v63  ;;  %2097 = vmatprep.subr.mxu0 %v347_v0  ;;  %v397_v62 = vld [vmem:[%s4287_s1 + $0x618] sm:$0xff]  ;;  %v412_v0 = vld [vmem:[%s4287_s1 + $0x690] sm:$0xff] }
  0x78   : > { %2132 = vmatprep.subr.mxu1 %v379_v1  ;;  %2098 = vmatpush3.msra.mxu0 %v331_v2  ;;  %v429_v63 = vld [vmem:[%s4287_s1 + $0x718] sm:$0xff]  ;;  %v444_v1 = vld [vmem:[%s4287_s1 + $0x790] sm:$0xff] }
  0x79   : > { %2133 = vmatpush3.msra.mxu1 %v363_v3  ;;  %2099 = vmatprep.subr.mxu0 %v346_v4  ;;  %v396_v2 = vld [vmem:[%s4287_s1 + $0x610] sm:$0xff]  ;;  %v411_v4 = vld [vmem:[%s4287_s1 + $0x688] sm:$0xff] }
  0x7a   : > { %2134 = vmatprep.subr.mxu1 %v378_v5  ;;  %2100 = vmatpush3.msra.mxu0 %v330_v6  ;;  %v428_v3 = vld [vmem:[%s4287_s1 + $0x710] sm:$0xff]  ;;  %v443_v5 = vld [vmem:[%s4287_s1 + $0x788] sm:$0xff] }
  0x7b   : > { %1060 = vmatprep.mubr.f32.mxu0 %v179_v7  ;;  %2135 = vmatpush3.msra.mxu1 %v362_v8  ;;  %v395_v6 = vld [vmem:[%s4287_s1 + $0x608] sm:$0xff]  ;;  %v410_v8 = vld [vmem:[%s4287_s1 + $0x680] sm:$0xff] }
  0x7c   : > { %1061 = vmatmul.mubr.f32.vlgmr.msra.gmra.mxu0 %v178_v9  ;;  %1130 = vmatprep.mubr.f32.mxu1 %v181_v10  ;;  %v427_v7 = vld [vmem:[%s4287_s1 + $0x708] sm:$0xff]  ;;  %v442_v9 = vld [vmem:[%s4287_s1 + $0x780] sm:$0xff] }
  0x7d   : > { %2139 = vmatprep.subr.mxu0 %v425_v11  ;;  %2174 = vmatprep.subr.mxu1 %v457_v12  ;;  %v394_v10 = vld [vmem:[%s4287_s1 + $0x600] sm:$0xff]  ;;  %v183_v11 = vld [vmem:[%s2850_s4 + $0x68] sm:$0xff] }
  0x7e   : > { %1131 = vmatmul.mubr.f32.vlgmr.msra.gmra.mxu1 %v180_v13  ;;  %2140 = vmatpush3.msra.mxu0 %v409_v14  ;;  %v426_v12 = vld [vmem:[%s4287_s1 + $0x700] sm:$0xff]  ;;  %v185_v14 = vld [vmem:[%s2850_s4 + $0x78] sm:$0xff] }
  0x7f   : > { %2175 = vmatpush3.msra.mxu1 %v441_v15  ;;  %2141 = vmatprep.subr.mxu0 %v424_v16  ;;  %v182_v13 = vld [vmem:[%s2850_s4 + $0x60] sm:$0xff]  ;;  %v489_v15 = vld [vmem:[%s4287_s1 + $0x8f8] sm:$0xff] }
  0x80   : > { %2176 = vmatprep.subr.mxu1 %v456_v17  ;;  %2142 = vmatpush3.msra.mxu0 %v408_v18  ;;  %v521_v16 = vld [vmem:[%s4287_s1 + $0x9f8] sm:$0xff]  ;;  %v184_v17 = vld [vmem:[%s2850_s4 + $0x70] sm:$0xff] }
  0x81   : > { %2177 = vmatpush3.msra.mxu1 %v440_v19  ;;  %2143 = vmatprep.subr.mxu0 %v423_v20  ;;  %v473_v18 = vld [vmem:[%s4287_s1 + $0x878] sm:$0xff]  ;;  %v488_v20 = vld [vmem:[%s4287_s1 + $0x8f0] sm:$0xff] }
  0x82   : > { %2178 = vmatprep.subr.mxu1 %v455_v21  ;;  %2144 = vmatpush3.msra.mxu0 %v407_v22  ;;  %v505_v19 = vld [vmem:[%s4287_s1 + $0x978] sm:$0xff]  ;;  %v520_v21 = vld [vmem:[%s4287_s1 + $0x9f0] sm:$0xff] }
  0x83   : > { %2179 = vmatpush3.msra.mxu1 %v439_v23  ;;  %2145 = vmatprep.subr.mxu0 %v422_v24  ;;  %v472_v22 = vld [vmem:[%s4287_s1 + $0x870] sm:$0xff]  ;;  %v487_v24 = vld [vmem:[%s4287_s1 + $0x8e8] sm:$0xff] }
  0x84   : > { %2180 = vmatprep.subr.mxu1 %v454_v25  ;;  %2146 = vmatpush3.msra.mxu0 %v406_v26  ;;  %v504_v23 = vld [vmem:[%s4287_s1 + $0x970] sm:$0xff]  ;;  %v519_v25 = vld [vmem:[%s4287_s1 + $0x9e8] sm:$0xff] }
  0x85   : > { %2181 = vmatpush3.msra.mxu1 %v438_v27  ;;  %2147 = vmatprep.subr.mxu0 %v421_v28  ;;  %v471_v26 = vld [vmem:[%s4287_s1 + $0x868] sm:$0xff]  ;;  %v486_v28 = vld [vmem:[%s4287_s1 + $0x8e0] sm:$0xff] }
  0x86   : > { %2182 = vmatprep.subr.mxu1 %v453_v29  ;;  %2148 = vmatpush3.msra.mxu0 %v405_v30  ;;  %v503_v27 = vld [vmem:[%s4287_s1 + $0x968] sm:$0xff]  ;;  %v518_v29 = vld [vmem:[%s4287_s1 + $0x9e0] sm:$0xff] }
  0x87   : > { %2183 = vmatpush3.msra.mxu1 %v437_v31  ;;  %2149 = vmatprep.subr.mxu0 %v420_v32  ;;  %v470_v30 = vld [vmem:[%s4287_s1 + $0x860] sm:$0xff]  ;;  %v485_v32 = vld [vmem:[%s4287_s1 + $0x8d8] sm:$0xff] }
  0x88   : > { %2184 = vmatprep.subr.mxu1 %v452_v33  ;;  %2150 = vmatpush3.msra.mxu0 %v404_v34  ;;  %v502_v31 = vld [vmem:[%s4287_s1 + $0x960] sm:$0xff]  ;;  %v517_v33 = vld [vmem:[%s4287_s1 + $0x9d8] sm:$0xff] }
  0x89   : > { %2185 = vmatpush3.msra.mxu1 %v436_v35  ;;  %2151 = vmatprep.subr.mxu0 %v419_v36  ;;  %v469_v34 = vld [vmem:[%s4287_s1 + $0x858] sm:$0xff]  ;;  %v484_v36 = vld [vmem:[%s4287_s1 + $0x8d0] sm:$0xff] }
  0x8a   : > { %2186 = vmatprep.subr.mxu1 %v451_v37  ;;  %2152 = vmatpush3.msra.mxu0 %v403_v38  ;;  %v501_v35 = vld [vmem:[%s4287_s1 + $0x958] sm:$0xff]  ;;  %v516_v37 = vld [vmem:[%s4287_s1 + $0x9d0] sm:$0xff] }
  0x8b   : > { %2187 = vmatpush3.msra.mxu1 %v435_v39  ;;  %2153 = vmatprep.subr.mxu0 %v418_v40  ;;  %v468_v38 = vld [vmem:[%s4287_s1 + $0x850] sm:$0xff]  ;;  %v483_v40 = vld [vmem:[%s4287_s1 + $0x8c8] sm:$0xff] }
  0x8c   : > { %2188 = vmatprep.subr.mxu1 %v450_v41  ;;  %2154 = vmatpush3.msra.mxu0 %v402_v42  ;;  %v500_v39 = vld [vmem:[%s4287_s1 + $0x950] sm:$0xff]  ;;  %v515_v41 = vld [vmem:[%s4287_s1 + $0x9c8] sm:$0xff] }
  0x8d   : > { %2189 = vmatpush3.msra.mxu1 %v434_v43  ;;  %2155 = vmatprep.subr.mxu0 %v417_v44  ;;  %v467_v42 = vld [vmem:[%s4287_s1 + $0x848] sm:$0xff]  ;;  %v482_v44 = vld [vmem:[%s4287_s1 + $0x8c0] sm:$0xff] }
  0x8e   : > { %2190 = vmatprep.subr.mxu1 %v449_v45  ;;  %2156 = vmatpush3.msra.mxu0 %v401_v46  ;;  %v499_v43 = vld [vmem:[%s4287_s1 + $0x948] sm:$0xff]  ;;  %v514_v45 = vld [vmem:[%s4287_s1 + $0x9c0] sm:$0xff] }
  0x8f   : > { %2191 = vmatpush3.msra.mxu1 %v433_v47  ;;  %2157 = vmatprep.subr.mxu0 %v416_v48  ;;  %v466_v46 = vld [vmem:[%s4287_s1 + $0x840] sm:$0xff]  ;;  %v481_v48 = vld [vmem:[%s4287_s1 + $0x8b8] sm:$0xff] }
  0x90   : > { %2192 = vmatprep.subr.mxu1 %v448_v49  ;;  %2158 = vmatpush3.msra.mxu0 %v400_v50  ;;  %v498_v47 = vld [vmem:[%s4287_s1 + $0x940] sm:$0xff]  ;;  %v513_v49 = vld [vmem:[%s4287_s1 + $0x9b8] sm:$0xff] }
  0x91   : > { %2193 = vmatpush3.msra.mxu1 %v432_v51  ;;  %2159 = vmatprep.subr.mxu0 %v415_v52  ;;  %v465_v50 = vld [vmem:[%s4287_s1 + $0x838] sm:$0xff]  ;;  %v480_v52 = vld [vmem:[%s4287_s1 + $0x8b0] sm:$0xff] }
  0x92   : > { %2194 = vmatprep.subr.mxu1 %v447_v53  ;;  %2160 = vmatpush3.msra.mxu0 %v399_v54  ;;  %v497_v51 = vld [vmem:[%s4287_s1 + $0x938] sm:$0xff]  ;;  %v512_v53 = vld [vmem:[%s4287_s1 + $0x9b0] sm:$0xff] }
  0x93   : > { %2195 = vmatpush3.msra.mxu1 %v431_v55  ;;  %2161 = vmatprep.subr.mxu0 %v414_v56  ;;  %v464_v54 = vld [vmem:[%s4287_s1 + $0x830] sm:$0xff]  ;;  %v479_v56 = vld [vmem:[%s4287_s1 + $0x8a8] sm:$0xff] }
  0x94   : > { %2196 = vmatprep.subr.mxu1 %v446_v57  ;;  %2162 = vmatpush3.msra.mxu0 %v398_v58  ;;  %v496_v55 = vld [vmem:[%s4287_s1 + $0x930] sm:$0xff]  ;;  %v511_v57 = vld [vmem:[%s4287_s1 + $0x9a8] sm:$0xff] }
  0x95   : > { %2197 = vmatpush3.msra.mxu1 %v430_v59  ;;  %2163 = vmatprep.subr.mxu0 %v413_v60  ;;  %v463_v58 = vld [vmem:[%s4287_s1 + $0x828] sm:$0xff]  ;;  %v478_v60 = vld [vmem:[%s4287_s1 + $0x8a0] sm:$0xff] }
  0x96   : > { %2198 = vmatprep.subr.mxu1 %v445_v61  ;;  %2164 = vmatpush3.msra.mxu0 %v397_v62  ;;  %v495_v59 = vld [vmem:[%s4287_s1 + $0x928] sm:$0xff]  ;;  %v510_v61 = vld [vmem:[%s4287_s1 + $0x9a0] sm:$0xff] }
  0x97   : > { %2199 = vmatpush3.msra.mxu1 %v429_v63  ;;  %2165 = vmatprep.subr.mxu0 %v412_v0  ;;  %v462_v62 = vld [vmem:[%s4287_s1 + $0x820] sm:$0xff]  ;;  %v477_v0 = vld [vmem:[%s4287_s1 + $0x898] sm:$0xff] }
  0x98   : > { %2200 = vmatprep.subr.mxu1 %v444_v1  ;;  %2166 = vmatpush3.msra.mxu0 %v396_v2  ;;  %v494_v63 = vld [vmem:[%s4287_s1 + $0x920] sm:$0xff]  ;;  %v509_v1 = vld [vmem:[%s4287_s1 + $0x998] sm:$0xff] }
  0x99   : > { %2201 = vmatpush3.msra.mxu1 %v428_v3  ;;  %2167 = vmatprep.subr.mxu0 %v411_v4  ;;  %v461_v2 = vld [vmem:[%s4287_s1 + $0x818] sm:$0xff]  ;;  %v476_v4 = vld [vmem:[%s4287_s1 + $0x890] sm:$0xff] }
  0x9a   : > { %2202 = vmatprep.subr.mxu1 %v443_v5  ;;  %2168 = vmatpush3.msra.mxu0 %v395_v6  ;;  %v493_v3 = vld [vmem:[%s4287_s1 + $0x918] sm:$0xff]  ;;  %v508_v5 = vld [vmem:[%s4287_s1 + $0x990] sm:$0xff] }
  0x9b   : > { %2203 = vmatpush3.msra.mxu1 %v427_v7  ;;  %2169 = vmatprep.subr.mxu0 %v410_v8  ;;  %v460_v6 = vld [vmem:[%s4287_s1 + $0x810] sm:$0xff]  ;;  %v475_v8 = vld [vmem:[%s4287_s1 + $0x888] sm:$0xff] }
  0x9c   : > { %2204 = vmatprep.subr.mxu1 %v442_v9  ;;  %2170 = vmatpush3.msra.mxu0 %v394_v10  ;;  %v492_v7 = vld [vmem:[%s4287_s1 + $0x910] sm:$0xff]  ;;  %v507_v9 = vld [vmem:[%s4287_s1 + $0x988] sm:$0xff] }
  0x9d   : > { %1200 = vmatprep.mubr.f32.mxu0 %v183_v11  ;;  %2205 = vmatpush3.msra.mxu1 %v426_v12  ;;  %v459_v10 = vld [vmem:[%s4287_s1 + $0x808] sm:$0xff]  ;;  %v474_v12 = vld [vmem:[%s4287_s1 + $0x880] sm:$0xff] }
  0x9e   : > { %1201 = vmatmul.mubr.f32.vlgmr.msra.gmra.mxu0 %v182_v13  ;;  %1270 = vmatprep.mubr.f32.mxu1 %v185_v14  ;;  %v491_v11 = vld [vmem:[%s4287_s1 + $0x908] sm:$0xff]  ;;  %v506_v13 = vld [vmem:[%s4287_s1 + $0x980] sm:$0xff] }
  0x9f   : > { %2209 = vmatprep.subr.mxu0 %v489_v15  ;;  %2244 = vmatprep.subr.mxu1 %v521_v16  ;;  %v458_v14 = vld [vmem:[%s4287_s1 + $0x800] sm:$0xff]  ;;  %v187_v15 = vld [vmem:[%s2850_s4 + $0x88] sm:$0xff] }
  0xa0   : > { %1271 = vmatmul.mubr.f32.vlgmr.msra.gmra.mxu1 %v184_v17  ;;  %2210 = vmatpush3.msra.mxu0 %v473_v18  ;;  %v490_v16 = vld [vmem:[%s4287_s1 + $0x900] sm:$0xff]  ;;  %v189_v18 = vld [vmem:[%s2850_s4 + $0x98] sm:$0xff] }
  0xa1   : > { %2245 = vmatpush3.msra.mxu1 %v505_v19  ;;  %2211 = vmatprep.subr.mxu0 %v488_v20  ;;  %v186_v17 = vld [vmem:[%s2850_s4 + $0x80] sm:$0xff]  ;;  %v553_v19 = vld [vmem:[%s4287_s1 + $0xaf8] sm:$0xff] }
  0xa2   : > { %2246 = vmatprep.subr.mxu1 %v520_v21  ;;  %2212 = vmatpush3.msra.mxu0 %v472_v22  ;;  %v585_v20 = vld [vmem:[%s4287_s1 + $0xbf8] sm:$0xff]  ;;  %v188_v21 = vld [vmem:[%s2850_s4 + $0x90] sm:$0xff] }
  0xa3   : > { %2247 = vmatpush3.msra.mxu1 %v504_v23  ;;  %2213 = vmatprep.subr.mxu0 %v487_v24  ;;  %v537_v22 = vld [vmem:[%s4287_s1 + $0xa78] sm:$0xff]  ;;  %v552_v24 = vld [vmem:[%s4287_s1 + $0xaf0] sm:$0xff] }
  0xa4   : > { %2248 = vmatprep.subr.mxu1 %v519_v25  ;;  %2214 = vmatpush3.msra.mxu0 %v471_v26  ;;  %v569_v23 = vld [vmem:[%s4287_s1 + $0xb78] sm:$0xff]  ;;  %v584_v25 = vld [vmem:[%s4287_s1 + $0xbf0] sm:$0xff] }
  0xa5   : > { %2249 = vmatpush3.msra.mxu1 %v503_v27  ;;  %2215 = vmatprep.subr.mxu0 %v486_v28  ;;  %v536_v26 = vld [vmem:[%s4287_s1 + $0xa70] sm:$0xff]  ;;  %v551_v28 = vld [vmem:[%s4287_s1 + $0xae8] sm:$0xff] }
  0xa6   : > { %2250 = vmatprep.subr.mxu1 %v518_v29  ;;  %2216 = vmatpush3.msra.mxu0 %v470_v30  ;;  %v568_v27 = vld [vmem:[%s4287_s1 + $0xb70] sm:$0xff]  ;;  %v583_v29 = vld [vmem:[%s4287_s1 + $0xbe8] sm:$0xff] }
  0xa7   : > { %2251 = vmatpush3.msra.mxu1 %v502_v31  ;;  %2217 = vmatprep.subr.mxu0 %v485_v32  ;;  %v535_v30 = vld [vmem:[%s4287_s1 + $0xa68] sm:$0xff]  ;;  %v550_v32 = vld [vmem:[%s4287_s1 + $0xae0] sm:$0xff] }
  0xa8   : > { %2252 = vmatprep.subr.mxu1 %v517_v33  ;;  %2218 = vmatpush3.msra.mxu0 %v469_v34  ;;  %v567_v31 = vld [vmem:[%s4287_s1 + $0xb68] sm:$0xff]  ;;  %v582_v33 = vld [vmem:[%s4287_s1 + $0xbe0] sm:$0xff] }
  0xa9   : > { %2253 = vmatpush3.msra.mxu1 %v501_v35  ;;  %2219 = vmatprep.subr.mxu0 %v484_v36  ;;  %v534_v34 = vld [vmem:[%s4287_s1 + $0xa60] sm:$0xff]  ;;  %v549_v36 = vld [vmem:[%s4287_s1 + $0xad8] sm:$0xff] }
  0xaa   : > { %2254 = vmatprep.subr.mxu1 %v516_v37  ;;  %2220 = vmatpush3.msra.mxu0 %v468_v38  ;;  %v566_v35 = vld [vmem:[%s4287_s1 + $0xb60] sm:$0xff]  ;;  %v581_v37 = vld [vmem:[%s4287_s1 + $0xbd8] sm:$0xff] }
  0xab   : > { %2255 = vmatpush3.msra.mxu1 %v500_v39  ;;  %2221 = vmatprep.subr.mxu0 %v483_v40  ;;  %v533_v38 = vld [vmem:[%s4287_s1 + $0xa58] sm:$0xff]  ;;  %v548_v40 = vld [vmem:[%s4287_s1 + $0xad0] sm:$0xff] }
  0xac   : > { %2256 = vmatprep.subr.mxu1 %v515_v41  ;;  %2222 = vmatpush3.msra.mxu0 %v467_v42  ;;  %v565_v39 = vld [vmem:[%s4287_s1 + $0xb58] sm:$0xff]  ;;  %v580_v41 = vld [vmem:[%s4287_s1 + $0xbd0] sm:$0xff] }
  0xad   : > { %2257 = vmatpush3.msra.mxu1 %v499_v43  ;;  %2223 = vmatprep.subr.mxu0 %v482_v44  ;;  %v532_v42 = vld [vmem:[%s4287_s1 + $0xa50] sm:$0xff]  ;;  %v547_v44 = vld [vmem:[%s4287_s1 + $0xac8] sm:$0xff] }
  0xae   : > { %2258 = vmatprep.subr.mxu1 %v514_v45  ;;  %2224 = vmatpush3.msra.mxu0 %v466_v46  ;;  %v564_v43 = vld [vmem:[%s4287_s1 + $0xb50] sm:$0xff]  ;;  %v579_v45 = vld [vmem:[%s4287_s1 + $0xbc8] sm:$0xff] }
  0xaf   : > { %2259 = vmatpush3.msra.mxu1 %v498_v47  ;;  %2225 = vmatprep.subr.mxu0 %v481_v48  ;;  %v531_v46 = vld [vmem:[%s4287_s1 + $0xa48] sm:$0xff]  ;;  %v546_v48 = vld [vmem:[%s4287_s1 + $0xac0] sm:$0xff] }
  0xb0   : > { %2260 = vmatprep.subr.mxu1 %v513_v49  ;;  %2226 = vmatpush3.msra.mxu0 %v465_v50  ;;  %v563_v47 = vld [vmem:[%s4287_s1 + $0xb48] sm:$0xff]  ;;  %v578_v49 = vld [vmem:[%s4287_s1 + $0xbc0] sm:$0xff] }
  0xb1   : > { %2261 = vmatpush3.msra.mxu1 %v497_v51  ;;  %2227 = vmatprep.subr.mxu0 %v480_v52  ;;  %v530_v50 = vld [vmem:[%s4287_s1 + $0xa40] sm:$0xff]  ;;  %v545_v52 = vld [vmem:[%s4287_s1 + $0xab8] sm:$0xff] }
  0xb2   : > { %2262 = vmatprep.subr.mxu1 %v512_v53  ;;  %2228 = vmatpush3.msra.mxu0 %v464_v54  ;;  %v562_v51 = vld [vmem:[%s4287_s1 + $0xb40] sm:$0xff]  ;;  %v577_v53 = vld [vmem:[%s4287_s1 + $0xbb8] sm:$0xff] }
  0xb3   : > { %2263 = vmatpush3.msra.mxu1 %v496_v55  ;;  %2229 = vmatprep.subr.mxu0 %v479_v56  ;;  %v529_v54 = vld [vmem:[%s4287_s1 + $0xa38] sm:$0xff]  ;;  %v544_v56 = vld [vmem:[%s4287_s1 + $0xab0] sm:$0xff] }
  0xb4   : > { %2264 = vmatprep.subr.mxu1 %v511_v57  ;;  %2230 = vmatpush3.msra.mxu0 %v463_v58  ;;  %v561_v55 = vld [vmem:[%s4287_s1 + $0xb38] sm:$0xff]  ;;  %v576_v57 = vld [vmem:[%s4287_s1 + $0xbb0] sm:$0xff] }
  0xb5   : > { %2265 = vmatpush3.msra.mxu1 %v495_v59  ;;  %2231 = vmatprep.subr.mxu0 %v478_v60  ;;  %v528_v58 = vld [vmem:[%s4287_s1 + $0xa30] sm:$0xff]  ;;  %v543_v60 = vld [vmem:[%s4287_s1 + $0xaa8] sm:$0xff] }
  0xb6   : > { %2266 = vmatprep.subr.mxu1 %v510_v61  ;;  %2232 = vmatpush3.msra.mxu0 %v462_v62  ;;  %v560_v59 = vld [vmem:[%s4287_s1 + $0xb30] sm:$0xff]  ;;  %v575_v61 = vld [vmem:[%s4287_s1 + $0xba8] sm:$0xff] }
  0xb7   : > { %2267 = vmatpush3.msra.mxu1 %v494_v63  ;;  %2233 = vmatprep.subr.mxu0 %v477_v0  ;;  %v527_v62 = vld [vmem:[%s4287_s1 + $0xa28] sm:$0xff]  ;;  %v542_v0 = vld [vmem:[%s4287_s1 + $0xaa0] sm:$0xff] }
  0xb8   : > { %2268 = vmatprep.subr.mxu1 %v509_v1  ;;  %2234 = vmatpush3.msra.mxu0 %v461_v2  ;;  %v559_v63 = vld [vmem:[%s4287_s1 + $0xb28] sm:$0xff]  ;;  %v574_v1 = vld [vmem:[%s4287_s1 + $0xba0] sm:$0xff] }
  0xb9   : > { %2269 = vmatpush3.msra.mxu1 %v493_v3  ;;  %2235 = vmatprep.subr.mxu0 %v476_v4  ;;  %v526_v2 = vld [vmem:[%s4287_s1 + $0xa20] sm:$0xff]  ;;  %v541_v4 = vld [vmem:[%s4287_s1 + $0xa98] sm:$0xff] }
  0xba   : > { %2270 = vmatprep.subr.mxu1 %v508_v5  ;;  %2236 = vmatpush3.msra.mxu0 %v460_v6  ;;  %v558_v3 = vld [vmem:[%s4287_s1 + $0xb20] sm:$0xff]  ;;  %v573_v5 = vld [vmem:[%s4287_s1 + $0xb98] sm:$0xff] }
  0xbb   : > { %2271 = vmatpush3.msra.mxu1 %v492_v7  ;;  %2237 = vmatprep.subr.mxu0 %v475_v8  ;;  %v525_v6 = vld [vmem:[%s4287_s1 + $0xa18] sm:$0xff]  ;;  %v540_v8 = vld [vmem:[%s4287_s1 + $0xa90] sm:$0xff] }
  0xbc   : > { %2272 = vmatprep.subr.mxu1 %v507_v9  ;;  %2238 = vmatpush3.msra.mxu0 %v459_v10  ;;  %v557_v7 = vld [vmem:[%s4287_s1 + $0xb18] sm:$0xff]  ;;  %v572_v9 = vld [vmem:[%s4287_s1 + $0xb90] sm:$0xff] }
  0xbd   : > { %2273 = vmatpush3.msra.mxu1 %v491_v11  ;;  %2239 = vmatprep.subr.mxu0 %v474_v12  ;;  %v524_v10 = vld [vmem:[%s4287_s1 + $0xa10] sm:$0xff]  ;;  %v539_v12 = vld [vmem:[%s4287_s1 + $0xa88] sm:$0xff] }
  0xbe   : > { %2274 = vmatprep.subr.mxu1 %v506_v13  ;;  %2240 = vmatpush3.msra.mxu0 %v458_v14  ;;  %v556_v11 = vld [vmem:[%s4287_s1 + $0xb10] sm:$0xff]  ;;  %v571_v13 = vld [vmem:[%s4287_s1 + $0xb88] sm:$0xff] }
  0xbf   : > { %1340 = vmatprep.mubr.f32.mxu0 %v187_v15  ;;  %2275 = vmatpush3.msra.mxu1 %v490_v16  ;;  %v523_v14 = vld [vmem:[%s4287_s1 + $0xa08] sm:$0xff]  ;;  %v538_v16 = vld [vmem:[%s4287_s1 + $0xa80] sm:$0xff] }
  0xc0   : > { %1341 = vmatmul.mubr.f32.vlgmr.msra.gmra.mxu0 %v186_v17  ;;  %1410 = vmatprep.mubr.f32.mxu1 %v189_v18  ;;  %v555_v15 = vld [vmem:[%s4287_s1 + $0xb08] sm:$0xff]  ;;  %v570_v17 = vld [vmem:[%s4287_s1 + $0xb80] sm:$0xff] }
  0xc1   : > { %2279 = vmatprep.subr.mxu0 %v553_v19  ;;  %2314 = vmatprep.subr.mxu1 %v585_v20  ;;  %v522_v18 = vld [vmem:[%s4287_s1 + $0xa00] sm:$0xff]  ;;  %v191_v19 = vld [vmem:[%s2850_s4 + $0xa8] sm:$0xff] }
  0xc2   : > { %1411 = vmatmul.mubr.f32.vlgmr.msra.gmra.mxu1 %v188_v21  ;;  %2280 = vmatpush3.msra.mxu0 %v537_v22  ;;  %v554_v20 = vld [vmem:[%s4287_s1 + $0xb00] sm:$0xff]  ;;  %v193_v22 = vld [vmem:[%s2850_s4 + $0xb8] sm:$0xff] }
  0xc3   : > { %2315 = vmatpush3.msra.mxu1 %v569_v23  ;;  %2281 = vmatprep.subr.mxu0 %v552_v24  ;;  %v190_v21 = vld [vmem:[%s2850_s4 + $0xa0] sm:$0xff]  ;;  %v617_v23 = vld [vmem:[%s4287_s1 + $0xcf8] sm:$0xff] }
  0xc4   : > { %2316 = vmatprep.subr.mxu1 %v584_v25  ;;  %2282 = vmatpush3.msra.mxu0 %v536_v26  ;;  %v649_v24 = vld [vmem:[%s4287_s1 + $0xdf8] sm:$0xff]  ;;  %v192_v25 = vld [vmem:[%s2850_s4 + $0xb0] sm:$0xff] }
  0xc5   : > { %2317 = vmatpush3.msra.mxu1 %v568_v27  ;;  %2283 = vmatprep.subr.mxu0 %v551_v28  ;;  %v601_v26 = vld [vmem:[%s4287_s1 + $0xc78] sm:$0xff]  ;;  %v616_v28 = vld [vmem:[%s4287_s1 + $0xcf0] sm:$0xff] }
  0xc6   : > { %2318 = vmatprep.subr.mxu1 %v583_v29  ;;  %2284 = vmatpush3.msra.mxu0 %v535_v30  ;;  %v633_v27 = vld [vmem:[%s4287_s1 + $0xd78] sm:$0xff]  ;;  %v648_v29 = vld [vmem:[%s4287_s1 + $0xdf0] sm:$0xff] }
  0xc7   : > { %2319 = vmatpush3.msra.mxu1 %v567_v31  ;;  %2285 = vmatprep.subr.mxu0 %v550_v32  ;;  %v600_v30 = vld [vmem:[%s4287_s1 + $0xc70] sm:$0xff]  ;;  %v615_v32 = vld [vmem:[%s4287_s1 + $0xce8] sm:$0xff] }
  0xc8   : > { %2320 = vmatprep.subr.mxu1 %v582_v33  ;;  %2286 = vmatpush3.msra.mxu0 %v534_v34  ;;  %v632_v31 = vld [vmem:[%s4287_s1 + $0xd70] sm:$0xff]  ;;  %v647_v33 = vld [vmem:[%s4287_s1 + $0xde8] sm:$0xff] }
  0xc9   : > { %2321 = vmatpush3.msra.mxu1 %v566_v35  ;;  %2287 = vmatprep.subr.mxu0 %v549_v36  ;;  %v599_v34 = vld [vmem:[%s4287_s1 + $0xc68] sm:$0xff]  ;;  %v614_v36 = vld [vmem:[%s4287_s1 + $0xce0] sm:$0xff] }
  0xca   : > { %2322 = vmatprep.subr.mxu1 %v581_v37  ;;  %2288 = vmatpush3.msra.mxu0 %v533_v38  ;;  %v631_v35 = vld [vmem:[%s4287_s1 + $0xd68] sm:$0xff]  ;;  %v646_v37 = vld [vmem:[%s4287_s1 + $0xde0] sm:$0xff] }
  0xcb   : > { %2323 = vmatpush3.msra.mxu1 %v565_v39  ;;  %2289 = vmatprep.subr.mxu0 %v548_v40  ;;  %v598_v38 = vld [vmem:[%s4287_s1 + $0xc60] sm:$0xff]  ;;  %v613_v40 = vld [vmem:[%s4287_s1 + $0xcd8] sm:$0xff] }
  0xcc   : > { %2324 = vmatprep.subr.mxu1 %v580_v41  ;;  %2290 = vmatpush3.msra.mxu0 %v532_v42  ;;  %v630_v39 = vld [vmem:[%s4287_s1 + $0xd60] sm:$0xff]  ;;  %v645_v41 = vld [vmem:[%s4287_s1 + $0xdd8] sm:$0xff] }
  0xcd   : > { %2325 = vmatpush3.msra.mxu1 %v564_v43  ;;  %2291 = vmatprep.subr.mxu0 %v547_v44  ;;  %v597_v42 = vld [vmem:[%s4287_s1 + $0xc58] sm:$0xff]  ;;  %v612_v44 = vld [vmem:[%s4287_s1 + $0xcd0] sm:$0xff] }
  0xce   : > { %2326 = vmatprep.subr.mxu1 %v579_v45  ;;  %2292 = vmatpush3.msra.mxu0 %v531_v46  ;;  %v629_v43 = vld [vmem:[%s4287_s1 + $0xd58] sm:$0xff]  ;;  %v644_v45 = vld [vmem:[%s4287_s1 + $0xdd0] sm:$0xff] }
  0xcf   : > { %2327 = vmatpush3.msra.mxu1 %v563_v47  ;;  %2293 = vmatprep.subr.mxu0 %v546_v48  ;;  %v596_v46 = vld [vmem:[%s4287_s1 + $0xc50] sm:$0xff]  ;;  %v611_v48 = vld [vmem:[%s4287_s1 + $0xcc8] sm:$0xff] }
  0xd0   : > { %2328 = vmatprep.subr.mxu1 %v578_v49  ;;  %2294 = vmatpush3.msra.mxu0 %v530_v50  ;;  %v628_v47 = vld [vmem:[%s4287_s1 + $0xd50] sm:$0xff]  ;;  %v643_v49 = vld [vmem:[%s4287_s1 + $0xdc8] sm:$0xff] }
  0xd1   : > { %2329 = vmatpush3.msra.mxu1 %v562_v51  ;;  %2295 = vmatprep.subr.mxu0 %v545_v52  ;;  %v595_v50 = vld [vmem:[%s4287_s1 + $0xc48] sm:$0xff]  ;;  %v610_v52 = vld [vmem:[%s4287_s1 + $0xcc0] sm:$0xff] }
  0xd2   : > { %2330 = vmatprep.subr.mxu1 %v577_v53  ;;  %2296 = vmatpush3.msra.mxu0 %v529_v54  ;;  %v627_v51 = vld [vmem:[%s4287_s1 + $0xd48] sm:$0xff]  ;;  %v642_v53 = vld [vmem:[%s4287_s1 + $0xdc0] sm:$0xff] }
  0xd3   : > { %2331 = vmatpush3.msra.mxu1 %v561_v55  ;;  %2297 = vmatprep.subr.mxu0 %v544_v56  ;;  %v594_v54 = vld [vmem:[%s4287_s1 + $0xc40] sm:$0xff]  ;;  %v609_v56 = vld [vmem:[%s4287_s1 + $0xcb8] sm:$0xff] }
  0xd4   : > { %2332 = vmatprep.subr.mxu1 %v576_v57  ;;  %2298 = vmatpush3.msra.mxu0 %v528_v58  ;;  %v626_v55 = vld [vmem:[%s4287_s1 + $0xd40] sm:$0xff]  ;;  %v641_v57 = vld [vmem:[%s4287_s1 + $0xdb8] sm:$0xff] }
  0xd5   : > { %2333 = vmatpush3.msra.mxu1 %v560_v59  ;;  %2299 = vmatprep.subr.mxu0 %v543_v60  ;;  %v593_v58 = vld [vmem:[%s4287_s1 + $0xc38] sm:$0xff]  ;;  %v608_v60 = vld [vmem:[%s4287_s1 + $0xcb0] sm:$0xff] }
  0xd6   : > { %2334 = vmatprep.subr.mxu1 %v575_v61  ;;  %2300 = vmatpush3.msra.mxu0 %v527_v62  ;;  %v625_v59 = vld [vmem:[%s4287_s1 + $0xd38] sm:$0xff]  ;;  %v640_v61 = vld [vmem:[%s4287_s1 + $0xdb0] sm:$0xff] }
  0xd7   : > { %2335 = vmatpush3.msra.mxu1 %v559_v63  ;;  %2301 = vmatprep.subr.mxu0 %v542_v0  ;;  %v592_v62 = vld [vmem:[%s4287_s1 + $0xc30] sm:$0xff]  ;;  %v607_v0 = vld [vmem:[%s4287_s1 + $0xca8] sm:$0xff] }
  0xd8   : > { %2336 = vmatprep.subr.mxu1 %v574_v1  ;;  %2302 = vmatpush3.msra.mxu0 %v526_v2  ;;  %v624_v63 = vld [vmem:[%s4287_s1 + $0xd30] sm:$0xff]  ;;  %v639_v1 = vld [vmem:[%s4287_s1 + $0xda8] sm:$0xff] }
  0xd9   : > { %2337 = vmatpush3.msra.mxu1 %v558_v3  ;;  %2303 = vmatprep.subr.mxu0 %v541_v4  ;;  %v591_v2 = vld [vmem:[%s4287_s1 + $0xc28] sm:$0xff]  ;;  %v606_v4 = vld [vmem:[%s4287_s1 + $0xca0] sm:$0xff] }
  0xda   : > { %2338 = vmatprep.subr.mxu1 %v573_v5  ;;  %2304 = vmatpush3.msra.mxu0 %v525_v6  ;;  %v623_v3 = vld [vmem:[%s4287_s1 + $0xd28] sm:$0xff]  ;;  %v638_v5 = vld [vmem:[%s4287_s1 + $0xda0] sm:$0xff] }
  0xdb   : > { %2339 = vmatpush3.msra.mxu1 %v557_v7  ;;  %2305 = vmatprep.subr.mxu0 %v540_v8  ;;  %v590_v6 = vld [vmem:[%s4287_s1 + $0xc20] sm:$0xff]  ;;  %v605_v8 = vld [vmem:[%s4287_s1 + $0xc98] sm:$0xff] }
  0xdc   : > { %2340 = vmatprep.subr.mxu1 %v572_v9  ;;  %2306 = vmatpush3.msra.mxu0 %v524_v10  ;;  %v622_v7 = vld [vmem:[%s4287_s1 + $0xd20] sm:$0xff]  ;;  %v637_v9 = vld [vmem:[%s4287_s1 + $0xd98] sm:$0xff] }
  0xdd   : > { %2341 = vmatpush3.msra.mxu1 %v556_v11  ;;  %2307 = vmatprep.subr.mxu0 %v539_v12  ;;  %v589_v10 = vld [vmem:[%s4287_s1 + $0xc18] sm:$0xff]  ;;  %v604_v12 = vld [vmem:[%s4287_s1 + $0xc90] sm:$0xff] }
  0xde   : > { %2342 = vmatprep.subr.mxu1 %v571_v13  ;;  %2308 = vmatpush3.msra.mxu0 %v523_v14  ;;  %v621_v11 = vld [vmem:[%s4287_s1 + $0xd18] sm:$0xff]  ;;  %v636_v13 = vld [vmem:[%s4287_s1 + $0xd90] sm:$0xff] }
  0xdf   : > { %2343 = vmatpush3.msra.mxu1 %v555_v15  ;;  %2309 = vmatprep.subr.mxu0 %v538_v16  ;;  %v588_v14 = vld [vmem:[%s4287_s1 + $0xc10] sm:$0xff]  ;;  %v603_v16 = vld [vmem:[%s4287_s1 + $0xc88] sm:$0xff] }
  0xe0   : > { %2344 = vmatprep.subr.mxu1 %v570_v17  ;;  %2310 = vmatpush3.msra.mxu0 %v522_v18  ;;  %v620_v15 = vld [vmem:[%s4287_s1 + $0xd10] sm:$0xff]  ;;  %v635_v17 = vld [vmem:[%s4287_s1 + $0xd88] sm:$0xff] }
  0xe1   : > { %1480 = vmatprep.mubr.f32.mxu0 %v191_v19  ;;  %2345 = vmatpush3.msra.mxu1 %v554_v20  ;;  %v587_v18 = vld [vmem:[%s4287_s1 + $0xc08] sm:$0xff]  ;;  %v602_v20 = vld [vmem:[%s4287_s1 + $0xc80] sm:$0xff] }
  0xe2   : > { %1481 = vmatmul.mubr.f32.vlgmr.msra.gmra.mxu0 %v190_v21  ;;  %1550 = vmatprep.mubr.f32.mxu1 %v193_v22  ;;  %v619_v19 = vld [vmem:[%s4287_s1 + $0xd08] sm:$0xff]  ;;  %v634_v21 = vld [vmem:[%s4287_s1 + $0xd80] sm:$0xff] }
  0xe3   : > { %2349 = vmatprep.subr.mxu0 %v617_v23  ;;  %2384 = vmatprep.subr.mxu1 %v649_v24  ;;  %v586_v22 = vld [vmem:[%s4287_s1 + $0xc00] sm:$0xff]  ;;  %v195_v23 = vld [vmem:[%s2850_s4 + $0xc8] sm:$0xff] }
  0xe4   : > { %1551 = vmatmul.mubr.f32.vlgmr.msra.gmra.mxu1 %v192_v25  ;;  %2350 = vmatpush3.msra.mxu0 %v601_v26  ;;  %v618_v24 = vld [vmem:[%s4287_s1 + $0xd00] sm:$0xff]  ;;  %v197_v26 = vld [vmem:[%s2850_s4 + $0xd8] sm:$0xff] }
  0xe5   : > { %2385 = vmatpush3.msra.mxu1 %v633_v27  ;;  %2351 = vmatprep.subr.mxu0 %v616_v28  ;;  %v194_v25 = vld [vmem:[%s2850_s4 + $0xc0] sm:$0xff]  ;;  %v681_v27 = vld [vmem:[%s4287_s1 + $0xef8] sm:$0xff] }
  0xe6   : > { %2386 = vmatprep.subr.mxu1 %v648_v29  ;;  %2352 = vmatpush3.msra.mxu0 %v600_v30  ;;  %v713_v28 = vld [vmem:[%s4287_s1 + $0xff8] sm:$0xff]  ;;  %v196_v29 = vld [vmem:[%s2850_s4 + $0xd0] sm:$0xff] }
  0xe7   : > { %2387 = vmatpush3.msra.mxu1 %v632_v31  ;;  %2353 = vmatprep.subr.mxu0 %v615_v32  ;;  %v665_v30 = vld [vmem:[%s4287_s1 + $0xe78] sm:$0xff]  ;;  %v680_v32 = vld [vmem:[%s4287_s1 + $0xef0] sm:$0xff] }
  0xe8   : > { %2388 = vmatprep.subr.mxu1 %v647_v33  ;;  %2354 = vmatpush3.msra.mxu0 %v599_v34  ;;  %v697_v31 = vld [vmem:[%s4287_s1 + $0xf78] sm:$0xff]  ;;  %v712_v33 = vld [vmem:[%s4287_s1 + $0xff0] sm:$0xff] }
  0xe9   : > { %2389 = vmatpush3.msra.mxu1 %v631_v35  ;;  %2355 = vmatprep.subr.mxu0 %v614_v36  ;;  %v664_v34 = vld [vmem:[%s4287_s1 + $0xe70] sm:$0xff]  ;;  %v679_v36 = vld [vmem:[%s4287_s1 + $0xee8] sm:$0xff] }
  0xea   : > { %2390 = vmatprep.subr.mxu1 %v646_v37  ;;  %2356 = vmatpush3.msra.mxu0 %v598_v38  ;;  %v696_v35 = vld [vmem:[%s4287_s1 + $0xf70] sm:$0xff]  ;;  %v711_v37 = vld [vmem:[%s4287_s1 + $0xfe8] sm:$0xff] }
  0xeb   : > { %2391 = vmatpush3.msra.mxu1 %v630_v39  ;;  %2357 = vmatprep.subr.mxu0 %v613_v40  ;;  %v663_v38 = vld [vmem:[%s4287_s1 + $0xe68] sm:$0xff]  ;;  %v678_v40 = vld [vmem:[%s4287_s1 + $0xee0] sm:$0xff] }
  0xec   : > { %2392 = vmatprep.subr.mxu1 %v645_v41  ;;  %2358 = vmatpush3.msra.mxu0 %v597_v42  ;;  %v695_v39 = vld [vmem:[%s4287_s1 + $0xf68] sm:$0xff]  ;;  %v710_v41 = vld [vmem:[%s4287_s1 + $0xfe0] sm:$0xff] }
  0xed   : > { %2393 = vmatpush3.msra.mxu1 %v629_v43  ;;  %2359 = vmatprep.subr.mxu0 %v612_v44  ;;  %v662_v42 = vld [vmem:[%s4287_s1 + $0xe60] sm:$0xff]  ;;  %v677_v44 = vld [vmem:[%s4287_s1 + $0xed8] sm:$0xff] }
  0xee   : > { %2394 = vmatprep.subr.mxu1 %v644_v45  ;;  %2360 = vmatpush3.msra.mxu0 %v596_v46  ;;  %v694_v43 = vld [vmem:[%s4287_s1 + $0xf60] sm:$0xff]  ;;  %v709_v45 = vld [vmem:[%s4287_s1 + $0xfd8] sm:$0xff] }
  0xef   : > { %2395 = vmatpush3.msra.mxu1 %v628_v47  ;;  %2361 = vmatprep.subr.mxu0 %v611_v48  ;;  %v661_v46 = vld [vmem:[%s4287_s1 + $0xe58] sm:$0xff]  ;;  %v676_v48 = vld [vmem:[%s4287_s1 + $0xed0] sm:$0xff] }
  0xf0   : > { %2396 = vmatprep.subr.mxu1 %v643_v49  ;;  %2362 = vmatpush3.msra.mxu0 %v595_v50  ;;  %v693_v47 = vld [vmem:[%s4287_s1 + $0xf58] sm:$0xff]  ;;  %v708_v49 = vld [vmem:[%s4287_s1 + $0xfd0] sm:$0xff] }
  0xf1   : > { %2397 = vmatpush3.msra.mxu1 %v627_v51  ;;  %2363 = vmatprep.subr.mxu0 %v610_v52  ;;  %v660_v50 = vld [vmem:[%s4287_s1 + $0xe50] sm:$0xff]  ;;  %v675_v52 = vld [vmem:[%s4287_s1 + $0xec8] sm:$0xff] }
  0xf2   : > { %2398 = vmatprep.subr.mxu1 %v642_v53  ;;  %2364 = vmatpush3.msra.mxu0 %v594_v54  ;;  %v692_v51 = vld [vmem:[%s4287_s1 + $0xf50] sm:$0xff]  ;;  %v707_v53 = vld [vmem:[%s4287_s1 + $0xfc8] sm:$0xff] }
  0xf3   : > { %2399 = vmatpush3.msra.mxu1 %v626_v55  ;;  %2365 = vmatprep.subr.mxu0 %v609_v56  ;;  %v659_v54 = vld [vmem:[%s4287_s1 + $0xe48] sm:$0xff]  ;;  %v674_v56 = vld [vmem:[%s4287_s1 + $0xec0] sm:$0xff] }
  0xf4   : > { %2400 = vmatprep.subr.mxu1 %v641_v57  ;;  %2366 = vmatpush3.msra.mxu0 %v593_v58  ;;  %v691_v55 = vld [vmem:[%s4287_s1 + $0xf48] sm:$0xff]  ;;  %v706_v57 = vld [vmem:[%s4287_s1 + $0xfc0] sm:$0xff] }
  0xf5   : > { %2401 = vmatpush3.msra.mxu1 %v625_v59  ;;  %2367 = vmatprep.subr.mxu0 %v608_v60  ;;  %v658_v58 = vld [vmem:[%s4287_s1 + $0xe40] sm:$0xff]  ;;  %v673_v60 = vld [vmem:[%s4287_s1 + $0xeb8] sm:$0xff] }
  0xf6   : > { %2402 = vmatprep.subr.mxu1 %v640_v61  ;;  %2368 = vmatpush3.msra.mxu0 %v592_v62  ;;  %v690_v59 = vld [vmem:[%s4287_s1 + $0xf40] sm:$0xff]  ;;  %v705_v61 = vld [vmem:[%s4287_s1 + $0xfb8] sm:$0xff] }
  0xf7   : > { %2403 = vmatpush3.msra.mxu1 %v624_v63  ;;  %2369 = vmatprep.subr.mxu0 %v607_v0  ;;  %v657_v62 = vld [vmem:[%s4287_s1 + $0xe38] sm:$0xff]  ;;  %v672_v0 = vld [vmem:[%s4287_s1 + $0xeb0] sm:$0xff] }
  0xf8   : > { %2404 = vmatprep.subr.mxu1 %v639_v1  ;;  %2370 = vmatpush3.msra.mxu0 %v591_v2  ;;  %v689_v63 = vld [vmem:[%s4287_s1 + $0xf38] sm:$0xff]  ;;  %v704_v1 = vld [vmem:[%s4287_s1 + $0xfb0] sm:$0xff] }
  0xf9   : > { %2405 = vmatpush3.msra.mxu1 %v623_v3  ;;  %2371 = vmatprep.subr.mxu0 %v606_v4  ;;  %v656_v2 = vld [vmem:[%s4287_s1 + $0xe30] sm:$0xff]  ;;  %v671_v4 = vld [vmem:[%s4287_s1 + $0xea8] sm:$0xff] }
  0xfa   : > { %2406 = vmatprep.subr.mxu1 %v638_v5  ;;  %2372 = vmatpush3.msra.mxu0 %v590_v6  ;;  %v688_v3 = vld [vmem:[%s4287_s1 + $0xf30] sm:$0xff]  ;;  %v703_v5 = vld [vmem:[%s4287_s1 + $0xfa8] sm:$0xff] }
  0xfb   : > { %2407 = vmatpush3.msra.mxu1 %v622_v7  ;;  %2373 = vmatprep.subr.mxu0 %v605_v8  ;;  %v655_v6 = vld [vmem:[%s4287_s1 + $0xe28] sm:$0xff]  ;;  %v670_v8 = vld [vmem:[%s4287_s1 + $0xea0] sm:$0xff] }
  0xfc   : > { %2408 = vmatprep.subr.mxu1 %v637_v9  ;;  %2374 = vmatpush3.msra.mxu0 %v589_v10  ;;  %v687_v7 = vld [vmem:[%s4287_s1 + $0xf28] sm:$0xff]  ;;  %v702_v9 = vld [vmem:[%s4287_s1 + $0xfa0] sm:$0xff] }
  0xfd   : > { %2409 = vmatpush3.msra.mxu1 %v621_v11  ;;  %2375 = vmatprep.subr.mxu0 %v604_v12  ;;  %v654_v10 = vld [vmem:[%s4287_s1 + $0xe20] sm:$0xff]  ;;  %v669_v12 = vld [vmem:[%s4287_s1 + $0xe98] sm:$0xff] }
  0xfe   : > { %2410 = vmatprep.subr.mxu1 %v636_v13  ;;  %2376 = vmatpush3.msra.mxu0 %v588_v14  ;;  %v686_v11 = vld [vmem:[%s4287_s1 + $0xf20] sm:$0xff]  ;;  %v701_v13 = vld [vmem:[%s4287_s1 + $0xf98] sm:$0xff] }
  0xff   : > { %2411 = vmatpush3.msra.mxu1 %v620_v15  ;;  %2377 = vmatprep.subr.mxu0 %v603_v16  ;;  %v653_v14 = vld [vmem:[%s4287_s1 + $0xe18] sm:$0xff]  ;;  %v668_v16 = vld [vmem:[%s4287_s1 + $0xe90] sm:$0xff] }
 0x100   : > { %2412 = vmatprep.subr.mxu1 %v635_v17  ;;  %2378 = vmatpush3.msra.mxu0 %v587_v18  ;;  %v685_v15 = vld [vmem:[%s4287_s1 + $0xf18] sm:$0xff]  ;;  %v700_v17 = vld [vmem:[%s4287_s1 + $0xf90] sm:$0xff] }
 0x101   : > { %2413 = vmatpush3.msra.mxu1 %v619_v19  ;;  %2379 = vmatprep.subr.mxu0 %v602_v20  ;;  %v652_v18 = vld [vmem:[%s4287_s1 + $0xe10] sm:$0xff]  ;;  %v667_v20 = vld [vmem:[%s4287_s1 + $0xe88] sm:$0xff] }
 0x102   : > { %2414 = vmatprep.subr.mxu1 %v634_v21  ;;  %2380 = vmatpush3.msra.mxu0 %v586_v22  ;;  %v684_v19 = vld [vmem:[%s4287_s1 + $0xf10] sm:$0xff]  ;;  %v699_v21 = vld [vmem:[%s4287_s1 + $0xf88] sm:$0xff] }
 0x103   : > { %1620 = vmatprep.mubr.f32.mxu0 %v195_v23  ;;  %2415 = vmatpush3.msra.mxu1 %v618_v24  ;;  %v651_v22 = vld [vmem:[%s4287_s1 + $0xe08] sm:$0xff]  ;;  %v666_v24 = vld [vmem:[%s4287_s1 + $0xe80] sm:$0xff] }
 0x104   : > { %1621 = vmatmul.mubr.f32.vlgmr.msra.gmra.mxu0 %v194_v25  ;;  %1690 = vmatprep.mubr.f32.mxu1 %v197_v26  ;;  %v683_v23 = vld [vmem:[%s4287_s1 + $0xf08] sm:$0xff]  ;;  %v698_v25 = vld [vmem:[%s4287_s1 + $0xf80] sm:$0xff] }
 0x105   : > { %2419 = vmatprep.subr.mxu0 %v681_v27  ;;  %2454 = vmatprep.subr.mxu1 %v713_v28  ;;  %v650_v26 = vld [vmem:[%s4287_s1 + $0xe00] sm:$0xff]  ;;  %v199_v27 = vld [vmem:[%s2850_s4 + $0xe8] sm:$0xff] }
 0x106   : > { %1691 = vmatmul.mubr.f32.vlgmr.msra.gmra.mxu1 %v196_v29  ;;  %2420 = vmatpush3.msra.mxu0 %v665_v30  ;;  %v682_v28 = vld [vmem:[%s4287_s1 + $0xf00] sm:$0xff]  ;;  %v201_v29 = vld [vmem:[%s2850_s4 + $0xf8] sm:$0xff] }
 0x107   : > { %2455 = vmatpush3.msra.mxu1 %v697_v31  ;;  %2421 = vmatprep.subr.mxu0 %v680_v32  ;;  %v198_v30 = vld [vmem:[%s2850_s4 + $0xe0] sm:$0xff]  ;;  %v200_v31 = vld [vmem:[%s2850_s4 + $0xf0] sm:$0xff]  ;;  %v1961_v32 = vpop.f32.mrf.mxu0  ;;  %s162_s4 = sand.u32 1, %s2584_s15  }
 0x108   : > { %2456 = vmatprep.subr.mxu1 %v712_v33  ;;  %2422 = vmatpush3.msra.mxu0 %v664_v34  ;;  %v1996_v33 = vpop.f32.mrf.mxu1  ;;  %s1920_s20 = sshll.u32 %s162_s4, 3  ;;  %s1844_s29 = scalar_lea.sflag [#allocation4], %s162_s4 }
 0x109   : > { %2457 = vmatpush3.msra.mxu1 %v696_v35  ;;  %2423 = vmatprep.subr.mxu0 %v679_v36  ;;  %v1962_v34 = vpop.f32.mrf.mxu0  ;;  %s164_s25 = scalar_lea.vmem [#allocation3], %s1920_s20 }
 0x10a   : > { %2458 = vmatprep.subr.mxu1 %v711_v37  ;;  %2424 = vmatpush3.msra.mxu0 %v663_v38  ;;  %v1963_v36 = vadd.f32 %v1962_v34, %v1961_v32  ;;  %v715_v37 = vstv %s714_s18  ;;  %v1997_v38 = vpop.f32.mrf.mxu1  ;;  %s1857_s10 = sshll.u32 %s164_s25, 4  ;;  %s1858_s10 = int_to_ptr.vmem [resolvable:$true] %s1857_s10 }
 0x10b   : > { %2459 = vmatpush3.msra.mxu1 %v695_v39  ;;  %2425 = vmatprep.subr.mxu0 %v678_v40  ;;  %s2532_s30 = scalar_lea.vmem %s1858_s10, 128  ;;  %p2539_p0 = scmp.lt.s32.totalorder %s1858_s10, %s2537_s6 }
 0x10c   : > { %2460 = vmatprep.subr.mxu1 %v710_v41  ;;  %2426 = vmatpush3.msra.mxu0 %v662_v42  ;;  %v783_v41 = vadd.f32 %v1963_v36, %v715_v37  ;;  %v1998_v42 = vadd.f32 %v1997_v38, %v1996_v33  ;;  %p2533_p11 = scmp.ne.s32.totalorder %s1858_s10, %s2532_s30  ;;  %p2540_p1 = scmp.lt.s32.totalorder %s2538_s2, %s2532_s30 }
 0x10d   : > { %2461 = vmatpush3.msra.mxu1 %v694_v43  ;;  %2427 = vmatprep.subr.mxu0 %v677_v44 }
 0x10e   : > { %2462 = vmatprep.subr.mxu1 %v709_v45  ;;  %2428 = vmatpush3.msra.mxu0 %v661_v46  ;;  %v853_v46 = vadd.f32 %v1998_v42, %v783_v41  ;;  %p2534_p12 = pnand %p2533_p11, %p2656_p5  ;;  %p2541_p2 = por %p2540_p1, %p2539_p0 }
 0x10f   : > { %2463 = vmatpush3.msra.mxu1 %v693_v47  ;;  %2429 = vmatprep.subr.mxu0 %v676_v48 }
 0x110   : > { %2464 = vmatprep.subr.mxu1 %v708_v49  ;;  %2430 = vmatpush3.msra.mxu0 %v660_v50  ;;  %p2535_p13 = pneg %p2534_p12 }
 0x111   : > { %2465 = vmatpush3.msra.mxu1 %v692_v51  ;;  %2431 = vmatprep.subr.mxu0 %v675_v52 }
 0x112   : > { %2466 = vmatprep.subr.mxu1 %v707_v53  ;;  %2432 = vmatpush3.msra.mxu0 %v659_v54  ;;  %p2542_p3 = pnand %p2541_p2, %p2535_p13 }
 0x113   : > { %2467 = vmatpush3.msra.mxu1 %v691_v55  ;;  %2433 = vmatprep.subr.mxu0 %v674_v56 }
 0x114   : > { %2468 = vmatprep.subr.mxu1 %v706_v57  ;;  %2434 = vmatpush3.msra.mxu0 %v658_v58 }
 0x115   : > { %2469 = vmatpush3.msra.mxu1 %v690_v59  ;;  %2435 = vmatprep.subr.mxu0 %v673_v60 }
 0x116   : > { %2470 = vmatprep.subr.mxu1 %v705_v61  ;;  %2436 = vmatpush3.msra.mxu0 %v657_v62 }
 0x117   : > { %2471 = vmatpush3.msra.mxu1 %v689_v63  ;;  %2437 = vmatprep.subr.mxu0 %v672_v0 }
 0x118   : > { %2472 = vmatprep.subr.mxu1 %v704_v1  ;;  %2438 = vmatpush3.msra.mxu0 %v656_v2 }
 0x119   : > { %2473 = vmatpush3.msra.mxu1 %v688_v3  ;;  %2439 = vmatprep.subr.mxu0 %v671_v4 }
 0x11a   : > { %2474 = vmatprep.subr.mxu1 %v703_v5  ;;  %2440 = vmatpush3.msra.mxu0 %v655_v6  ;;  %v2031_v35 = vpop.f32.mrf.mxu0 }
 0x11b   : > { %2475 = vmatpush3.msra.mxu1 %v687_v7  ;;  %2441 = vmatprep.subr.mxu0 %v670_v8 }
 0x11c   : > { %2476 = vmatprep.subr.mxu1 %v702_v9  ;;  %2442 = vmatpush3.msra.mxu0 %v654_v10  ;;  %v2066_v39 = vpop.f32.mrf.mxu1  ;;  %v2032_v40 = vpop.f32.mrf.mxu0 }
 0x11d   : > { %2477 = vmatpush3.msra.mxu1 %v686_v11  ;;  %2443 = vmatprep.subr.mxu0 %v669_v12  ;;  %v2033_v44 = vadd.f32 %v2032_v40, %v2031_v35 }
 0x11e   : > { %2478 = vmatprep.subr.mxu1 %v701_v13  ;;  %2444 = vmatpush3.msra.mxu0 %v653_v14  ;;  %v2067_v45 = vpop.f32.mrf.mxu1 }
 0x11f   : > { %2479 = vmatpush3.msra.mxu1 %v685_v15  ;;  %2445 = vmatprep.subr.mxu0 %v668_v16  ;;  %v923_v49 = vadd.f32 %v2033_v44, %v853_v46  ;;  %v2068_v50 = vadd.f32 %v2067_v45, %v2066_v39 }
 0x120   : > { %2480 = vmatprep.subr.mxu1 %v700_v17  ;;  %2446 = vmatpush3.msra.mxu0 %v652_v18 }
 0x121   : > { %2481 = vmatpush3.msra.mxu1 %v684_v19  ;;  %2447 = vmatprep.subr.mxu0 %v667_v20  ;;  %v993_v54 = vadd.f32 %v2068_v50, %v923_v49 }
 0x122   : > { %2482 = vmatprep.subr.mxu1 %v699_v21  ;;  %2448 = vmatpush3.msra.mxu0 %v651_v22 }
 0x123   : > { %2483 = vmatpush3.msra.mxu1 %v683_v23  ;;  %2449 = vmatprep.subr.mxu0 %v666_v24 }
 0x124   : > { %2484 = vmatprep.subr.mxu1 %v698_v25  ;;  %2450 = vmatpush3.msra.mxu0 %v650_v26 }
 0x125   : > { %1760 = vmatprep.mubr.f32.mxu0 %v199_v27  ;;  %2485 = vmatpush3.msra.mxu1 %v682_v28 }
 0x126   : > { %1830 = vmatprep.mubr.f32.mxu1 %v201_v29  ;;  %1761 = vmatmul.mubr.f32.vlgmr.msra.gmra.mxu0 %v198_v30 }
 0x127   : > { %1831 = vmatmul.mubr.f32.vlgmr.msra.gmra.mxu1 %v200_v31 }
 0x13c   : > { %v2101_v43 = vpop.f32.mrf.mxu0 }
 0x13e   : > { %v2136_v47 = vpop.f32.mrf.mxu1  ;;  %v2102_v48 = vpop.f32.mrf.mxu0 }
 0x13f   : > { %v2103_v52 = vadd.f32 %v2102_v48, %v2101_v43 }
 0x140   : > { %v2137_v53 = vpop.f32.mrf.mxu1 }
 0x141   : > { %v1063_v57 = vadd.f32 %v2103_v52, %v993_v54  ;;  %v2138_v58 = vadd.f32 %v2137_v53, %v2136_v47 }
 0x143   : > { %v1133_v62 = vadd.f32 %v2138_v58, %v1063_v57 }
 0x15e   : > { %v2171_v51 = vpop.f32.mrf.mxu0 }
 0x160   : > { %v2206_v55 = vpop.f32.mrf.mxu1  ;;  %v2172_v56 = vpop.f32.mrf.mxu0 }
 0x161   : > { %v2173_v60 = vadd.f32 %v2172_v56, %v2171_v51 }
 0x162   : > { %v2207_v61 = vpop.f32.mrf.mxu1 }
 0x163   : > { %v1203_v1 = vadd.f32 %v2173_v60, %v1133_v62  ;;  %v2208_v2 = vadd.f32 %v2207_v61, %v2206_v55 }
 0x165   : > { %v1273_v6 = vadd.f32 %v2208_v2, %v1203_v1 }
 0x180   : > { %v2241_v59 = vpop.f32.mrf.mxu0 }
 0x182   : > { %v2276_v63 = vpop.f32.mrf.mxu1  ;;  %v2242_v0 = vpop.f32.mrf.mxu0 }
 0x183   : > { %v2243_v4 = vadd.f32 %v2242_v0, %v2241_v59 }
 0x184   : > { %v2277_v5 = vpop.f32.mrf.mxu1 }
 0x185   : > { %v1343_v9 = vadd.f32 %v2243_v4, %v1273_v6  ;;  %v2278_v10 = vadd.f32 %v2277_v5, %v2276_v63 }
 0x187   : > { %v1413_v14 = vadd.f32 %v2278_v10, %v1343_v9 }
 0x1a2   : > { %v2311_v3 = vpop.f32.mrf.mxu0 }
 0x1a4   : > { %v2346_v7 = vpop.f32.mrf.mxu1  ;;  %v2312_v8 = vpop.f32.mrf.mxu0 }
 0x1a5   : > { %v2313_v12 = vadd.f32 %v2312_v8, %v2311_v3 }
 0x1a6   : > { %v2347_v13 = vpop.f32.mrf.mxu1 }
 0x1a7   : > { %v1483_v17 = vadd.f32 %v2313_v12, %v1413_v14  ;;  %v2348_v18 = vadd.f32 %v2347_v13, %v2346_v7 }
 0x1a9   : > { %v1553_v21 = vadd.f32 %v2348_v18, %v1483_v17 }
 0x1c4   : > { %v2381_v11 = vpop.f32.mrf.mxu0 }
 0x1c6   : > { %v2416_v15 = vpop.f32.mrf.mxu1  ;;  %v2382_v16 = vpop.f32.mrf.mxu0 }
 0x1c7   : > { %v2383_v19 = vadd.f32 %v2382_v16, %v2381_v11 }
 0x1c8   : > { %v2417_v20 = vpop.f32.mrf.mxu1 }
 0x1c9   : > { %v1623_v22 = vadd.f32 %v2383_v19, %v1553_v21  ;;  %v2418_v23 = vadd.f32 %v2417_v20, %v2416_v15 }
 0x1cb   : > { %v1693_v28 = vadd.f32 %v2418_v23, %v1623_v22 }
 0x1e6   : > { %v2451_v24 = vpop.f32.mrf.mxu0 }
 0x1e7   : > { %v2486_v25 = vpop.f32.mrf.mxu1 }
 0x1e8   : > { %v2452_v26 = vpop.f32.mrf.mxu0 }
 0x1e9   : > { %v2487_v27 = vpop.f32.mrf.mxu1  ;;  %v2453_v29 = vadd.f32 %v2452_v26, %v2451_v24 }
 0x1ea   : > { %v2488_v31 = vadd.f32 %v2487_v27, %v2486_v25 }
 0x1eb   : > { %v1763_v30 = vadd.f32 %v2453_v29, %v1693_v28 }
 0x1ed   : > { %v1833_v32 = vadd.f32 %v2488_v31, %v1763_v30 }
 0x1ef   : > { %v1923_v33 = vmul.f32 -1.442695, %v1833_v32 }
 0x1f1   : > { %2528 = vpow2.f32 %v1923_v33 }
 0x1fe   : > { %v2529_v34 = vpop.eup %2528 }
 0x1ff   : > { %v1839_v35 = vadd.f32 1.0, %v2529_v34 }
 0x201   : > { %2530 = vrcp.f32 %v1839_v35 }
 0x20e   : > { %v2531_v36 = vpop.eup %2530 }
 0x20f   : > { %1842 = vst [vmem:[%s164_s25] sm:$0xff] %v2531_v36 }
 0x210   : > { %2545 = shalt.err (!%p2542_p3)
}
 0x211   : > { %s2546_s7 = scalar_lea.hbm %s4251_s28, 128  ;;  %s2550_s12 = scalar_lea.hbm %s4289_s3, 512 }
 0x212   : > { %p2547_p4 = scmp.ne.s32.totalorder %s4251_s28, %s2546_s7  ;;  %p2551_p9 = scmp.lt.s32.totalorder %s4251_s28, %s4289_s3 }
 0x213   : > { %p2552_p10 = scmp.lt.s32.totalorder %s2550_s12, %s2546_s7 }
 0x214   : > { %p2548_p7 = pnand %p2547_p4, %p2656_p5 }
 0x215   : > { %p2553_p11 = por %p2552_p10, %p2551_p9 }
 0x216   : > { %p2549_p8 = pneg %p2548_p7 }
 0x218   : > { %p2554_p12 = pnand %p2553_p11, %p2549_p8 }
 0x21a   : > { %2557 = shalt.err (!%p2554_p12)
}
 0x21b   : > { %2489 = dma.vmem_to_hbm [thread:$0]  (%p2656_p5), %s1858_s10, 128, %s4251_s28, %s1844_s29  }
 0x21c PF: > { %p2495_p13 = scmp.ge.s32.totalorder %s2592_s17, 2  ;;  %s1869_s18 = sand.u32 1, %s2580_s14  }
 0x21d   : > { %s1870_s4 = scalar_lea.sflag [#allocation4], %s1869_s18 }
 0x21e   : > { %p2492_p0 = pnand %p2495_p13, %p2660_p6 }
 0x220   : > { %p2493_p1 = pneg %p2492_p0 }
 0x222   : > { %2575 = dma.done.wait (%p2493_p1), %s1870_s4, 128  }
 0x223   : > { %2577 = vsyncadd (%p2493_p1), %s1870_s4, 4294967168  ;;  %p14_p2 = scmp.ge.s32.totalorder %s2643_s19, 6   ;;  %s4292_s14 = smov %s2584_s15 }
 0x224   : > { %s4293_s15 = smov %s2588_s16  ;;  %s4294_s16 = smov %s2654_s22 }
 0x225   : > { %s4295_s17 = smov %s2643_s19  ;;  %16 = sbr.rel (!%p14_p2) target bundleno = 5 (0x5), region = 67 }
 0x22a   :  { %1875 = vsyncpa [#allocation4], 1 }
 0x22b   :  { %1877 = vsyncpa [#allocation4 + $0x1], 1 }

</bundles_post_ra>
